<compile_context>
chip_gen: v7x
topology: tpu7x:2x2x1
jax: 0.10.0
libtpu: 0.0.40
codegen_flags: <defaults>
</compile_context>

<pallas_src>
import numpy as np
import jax
import jax.numpy as jnp
from jax.experimental import pallas as pl
from jax.experimental.pallas import tpu as pltpu

# ----------------------------- config (synthetic, small) -----------------------------
SAMPLE_RATE = 2000
N_FFT       = 64
HOP_LENGTH  = 32
N_MELS      = 32
FMIN        = 20.0
FMAX        = 1000.0
N_FREQS     = N_FFT // 2 + 1                      # 33
REF         = 1.0
AMIN        = 1e-10
DB_OFFSET   = float(10.0 * np.log10(max(AMIN, REF)))   # 0.0 for ref=1.0 (top_db=None -> no clamp)
EPS         = float(np.finfo(np.float32).eps)

# Padded lane widths (full-vreg, lane-dense).
F_PAD   = 128                                     # padded number of freq lanes  (>= N_FREQS)
MEL_PAD = 128                                     # padded number of mel lanes   (>= N_MELS)


def _round_up(x, m):
    return (x + m - 1) // m * m


# ----------------------------- deterministic parameter setup -----------------------------
def make_fused_dft(n_fft, f_pad):
    """Fused, zero-padded window-weighted DFT matrix, shape (n_fft, 2*f_pad).

    Lanes [0, n_freqs) hold the hann-weighted real DFT, lanes [f_pad, f_pad+n_freqs) the
    (negated) imaginary DFT, rest is zero.  Matches torchlibrosa's STFT conv kernels.
    """
    n = np.arange(n_fft)
    k = np.arange(n_fft // 2 + 1)
    ang = 2.0 * np.pi * np.outer(n, k) / n_fft
    win = 0.5 - 0.5 * np.cos(2.0 * np.pi * n / n_fft)          # periodic hann
    w = np.zeros((n_fft, 2 * f_pad), dtype=np.float32)
    w[:, : n_fft // 2 + 1] = (win[:, None] * np.cos(ang)).astype(np.float32)
    w[:, f_pad : f_pad + n_fft // 2 + 1] = (-win[:, None] * np.sin(ang)).astype(np.float32)
    return w


def make_mel_filterbank(sr, n_fft, n_mels, fmin, fmax):
    """Deterministic triangular mel filterbank (HTK mel scale), shape (n_freqs, n_mels)."""
    def hz_to_mel(f):
        return 2595.0 * np.log10(1.0 + f / 700.0)

    def mel_to_hz(m):
        return 700.0 * (10.0 ** (m / 2595.0) - 1.0)

    n_freqs = n_fft // 2 + 1
    freqs = np.linspace(0.0, sr / 2.0, n_freqs)
    mel_pts = np.linspace(hz_to_mel(fmin), hz_to_mel(fmax), n_mels + 2)
    hz_pts = mel_to_hz(mel_pts)
    fb = np.zeros((n_freqs, n_mels), dtype=np.float32)
    for m in range(n_mels):
        f_l, f_c, f_r = hz_pts[m], hz_pts[m + 1], hz_pts[m + 2]
        up = (freqs - f_l) / max(f_c - f_l, 1e-9)
        down = (f_r - freqs) / max(f_r - f_c, 1e-9)
        fb[:, m] = np.maximum(0.0, np.minimum(up, down))
    return fb


def pad_mel_filterbank(melw, f_pad, mel_pad):
    """(n_freqs, n_mels) -> zero-padded (f_pad, mel_pad)."""
    out = np.zeros((f_pad, mel_pad), dtype=np.float32)
    out[: melw.shape[0], : melw.shape[1]] = melw
    return out


# ----------------------------- Pallas kernel -----------------------------
def _make_kernel(batch, t_pad):
    nrows = batch * 4 * t_pad          # rows of the fused DFT LHS (all channels, all batches)
    hop = HOP_LENGTH

    def logmel_iv_kernel(blocks_ref, dftw_ref, melw_ref, out_ref, pack_ref):
        """Single invocation, whole problem folded into the matmul M axis.

        blocks_ref: ((B*4+1)*t_pad, HOP)   hop blocks, channels/batches stacked along rows
                                           (trailing all-zero slab keeps the +1 slice in bounds)
        dftw_ref:   (N_FFT, 2*F_PAD)       fused hann-weighted DFT [real | imag], zero-padded
        melw_ref:   (F_PAD, MEL_PAD)       zero-padded mel filterbank
        out_ref:    (B*7*t_pad, MEL_PAD)   per batch: [logmel ch0..3 | IVx | IVy | IVz]
        pack_ref:   (B*7*t_pad, F_PAD)     VMEM scratch holding [spec | normalized IV] rows
        """
        blocks = blocks_ref[...]                                   # ((B*4+1)*t_pad, 32)
        tops = blocks[:nrows]                                      # block_t      (aligned)
        bots = blocks[1:nrows + 1]                                 # block_{t+1}  (sublane +1)

        # --- fused windowed DFT for all batches & channels (frame = [top | bot]):
        #     RI = tops @ W[:hop] + bots @ W[hop:]      -> (B*4*t_pad, 256)
        ri = (jnp.dot(tops, dftw_ref[:hop, :], preferred_element_type=jnp.float32)
              + jnp.dot(bots, dftw_ref[hop:, :], preferred_element_type=jnp.float32))
        real = ri[:, :F_PAD]                                       # (B*4*t_pad, 128)
        imag = ri[:, F_PAD:]                                       # (B*4*t_pad, 128)

        # --- pack [spec ch0..3 | IVx | IVy | IVz] per batch into the VMEM scratch.
        for b in range(batch):                                     # static unroll (B small)
            src = b * 4 * t_pad
            dst = b * 7 * t_pad
            r = real[src:src + 4 * t_pad]
            im = imag[src:src + 4 * t_pad]
            pack_ref[dst:dst + 4 * t_pad] = r * r + im * im        # power spectrogram

            r0, i0 = r[:t_pad], im[:t_pad]                         # omni channel
            ivx = r0 * r[t_pad:2 * t_pad] + i0 * im[t_pad:2 * t_pad]
            ivy = r0 * r[2 * t_pad:3 * t_pad] + i0 * im[2 * t_pad:3 * t_pad]
            ivz = r0 * r[3 * t_pad:4 * t_pad] + i0 * im[3 * t_pad:4 * t_pad]
            # Exact reciprocal (approx=True was the source of the 3e-3 mismatches).
            inv = 1.0 / (jnp.sqrt(ivx * ivx + ivy * ivy + ivz * ivz) + EPS)
            pack_ref[dst + 4 * t_pad:dst + 5 * t_pad] = ivx * inv
            pack_ref[dst + 5 * t_pad:dst + 6 * t_pad] = ivy * inv
            pack_ref[dst + 6 * t_pad:dst + 7 * t_pad] = ivz * inv

        # --- ONE fused mel projection for 4 logmel channels + 3 IV components, all batches.
        mel = jnp.dot(pack_ref[...], melw_ref[...],
                      preferred_element_type=jnp.float32)          # (B*7*t_pad, 128)

        # log-compress only the spectrogram rows; IV rows pass through unchanged.
        # All slice boundaries are multiples of t_pad (multiple of 8) -> unmasked full-lane vst.
        for b in range(batch):
            dst = b * 7 * t_pad
            spec_mel = mel[dst:dst + 4 * t_pad]
            out_ref[dst:dst + 4 * t_pad] = (
                10.0 * jnp.log10(jnp.maximum(spec_mel, AMIN)) - DB_OFFSET)
            out_ref[dst + 4 * t_pad:dst + 7 * t_pad] = mel[dst + 4 * t_pad:dst + 7 * t_pad]

    return logmel_iv_kernel


# ----------------------------- wrapper -----------------------------
def make_hop_blocks(x):
    """(B, 4, L) -> hop-block LHS ((B*4+1)*t_pad, HOP), plus (T, t_pad).

    Reflect center-pad, then reshape into non-overlapping hop blocks (no gather, no concat,
    no redundant framed buffer).  One jnp.pad adds (a) zero time-blocks up to t_pad per
    channel and (b) one extra all-zero channel slab so the kernel's block_{t+1} slice never
    reads out of bounds.
    """
    B, C, L = x.shape
    assert C == 4, "FOA input must have 4 channels"
    assert N_FFT == 2 * HOP_LENGTH and L % HOP_LENGTH == 0
    pad = N_FFT // 2
    xp = jnp.pad(x.astype(jnp.float32), ((0, 0), (0, 0), (pad, pad)), mode="reflect")
    nblk = xp.shape[-1] // HOP_LENGTH                              # T + 1 hop blocks
    T = nblk - 1                                                   # = 1 + L // hop
    t_pad = _round_up(nblk, 8)                                     # per-channel row stride
    blocks = xp.reshape(B * C, nblk, HOP_LENGTH)                   # free reshape
    blocks = jnp.pad(blocks, ((0, 1), (0, t_pad - nblk), (0, 0)))  # one pad op
    blocks = blocks.reshape((B * C + 1) * t_pad, HOP_LENGTH)       # free reshape
    return blocks, T, t_pad


def logmel_intensity_extract(x, dftw_fused, melw_pad):
    B = x.shape[0]
    blocks, T, t_pad = make_hop_blocks(x)                          # ((B*4+1)*t_pad, 32)

    out = pl.pallas_call(
        _make_kernel(B, t_pad),
        out_shape=jax.ShapeDtypeStruct((B * 7 * t_pad, MEL_PAD), jnp.float32),
        # Single invocation (no grid): whole arrays resident in VMEM (< 1 MiB total).
        in_specs=[
            pl.BlockSpec(memory_space=pltpu.MemorySpace.VMEM),
            pl.BlockSpec(memory_space=pltpu.MemorySpace.VMEM),
            pl.BlockSpec(memory_space=pltpu.MemorySpace.VMEM),
        ],
        out_specs=pl.BlockSpec(memory_space=pltpu.MemorySpace.VMEM),
        scratch_shapes=[pltpu.VMEM((B * 7 * t_pad, F_PAD), jnp.float32)],
    )(blocks, dftw_fused, melw_pad)

    # (B*7*t_pad, 128) -> (B, 7, t_pad, 128) is the SAME row-major layout (free reshape),
    # then a single static slice back to PyTorch's (B, 7, T, n_mels).
    return out.reshape(B, 7, t_pad, MEL_PAD)[:, :, :T, :N_MELS]


# ----------------------------- pure-JAX reference -----------------------------
def reference_forward(x, dft_real, dft_imag, melw):
    B, C, L = x.shape
    pad = N_FFT // 2
    xp = jnp.pad(x.astype(jnp.float32), ((0, 0), (0, 0), (pad, pad)), mode="reflect")
    T = 1 + L // HOP_LENGTH
    idx = (jnp.arange(T) * HOP_LENGTH)[:, None] + jnp.arange(N_FFT)[None, :]
    frames = xp[:, :, idx]                                         # (B, 4, T, n_fft)
    real = jnp.einsum("bctn,nf->bctf", frames, dft_real)
    imag = jnp.einsum("bctn,nf->bctf", frames, dft_imag)
    spec = real ** 2 + imag ** 2
    mel = jnp.einsum("bctf,fm->bctm", spec, melw)
    logmel = 10.0 * jnp.log10(jnp.maximum(mel, AMIN)) - DB_OFFSET
    ivx = real[:, 0] * real[:, 1] + imag[:, 0] * imag[:, 1]
    ivy = real[:, 0] * real[:, 2] + imag[:, 0] * imag[:, 2]
    ivz = real[:, 0] * real[:, 3] + imag[:, 0] * imag[:, 3]
    normal = jnp.sqrt(ivx ** 2 + ivy ** 2 + ivz ** 2) + EPS
    iv = jnp.stack(
        [jnp.einsum("btf,fm->btm", ivx / normal, melw),
         jnp.einsum("btf,fm->btm", ivy / normal, melw),
         jnp.einsum("btf,fm->btm", ivz / normal, melw)],
        axis=1,
    )
    return jnp.concatenate([logmel, iv], axis=1)


# ----------------------------- main -----------------------------
if __name__ == "__main__":
    key = jax.random.PRNGKey(0)
    B, C, L = 2, 4, 1024
    x = jax.random.normal(key, (B, C, L), dtype=jnp.float32)

    dftw_fused_np = make_fused_dft(N_FFT, F_PAD)                           # (64, 256)
    melw_np = make_mel_filterbank(SAMPLE_RATE, N_FFT, N_MELS, FMIN, FMAX)  # (33, 32)
    melw_pad_np = pad_mel_filterbank(melw_np, F_PAD, MEL_PAD)              # (128, 128)

    dftw_fused = jnp.asarray(dftw_fused_np)
    melw_pad = jnp.asarray(melw_pad_np)
    # Unpadded views for the independent pure-JAX reference.
    dft_real = jnp.asarray(dftw_fused_np[:, :N_FREQS])
    dft_imag = jnp.asarray(dftw_fused_np[:, F_PAD:F_PAD + N_FREQS])
    melw = jnp.asarray(melw_np)

    out = logmel_intensity_extract(x, dftw_fused, melw_pad)
    out = jax.block_until_ready(out)

    ref = jax.block_until_ready(reference_forward(x, dft_real, dft_imag, melw))

    T = 1 + L // HOP_LENGTH
    assert out.shape == (B, 7, T, N_MELS), out.shape
    np.testing.assert_allclose(np.asarray(out), np.asarray(ref), rtol=2e-3, atol=2e-3)

    print("KERNEL_OK")
</pallas_src>

<mosaic_0001>
module attributes {stable_mosaic.version = 11 : i64} {
  func.func @logmel_iv_kernel(%arg0: memref<360x32xf32, #tpu.memory_space<vmem>>, %arg1: memref<64x256xf32, #tpu.memory_space<vmem>>, %arg2: memref<128x128xf32, #tpu.memory_space<vmem>>, %arg3: memref<560x128xf32, #tpu.memory_space<vmem>>, %arg4: memref<560x128xf32, #tpu.memory_space<vmem>>) attributes {dimension_semantics = [], scalar_prefetch = 0 : i64, scratch_operands = 1 : i64, tpu.core_type = #tpu.core_type<tc>} {
    %c0 = arith.constant 0 : index
    %c0_0 = arith.constant 0 : index
    %0 = vector.load %arg0[%c0, %c0_0] : memref<360x32xf32, #tpu.memory_space<vmem>>, vector<360x32xf32>
    %1 = vector.extract_strided_slice %0 {offsets = [0, 0], sizes = [320, 32], strides = [1, 1]} : vector<360x32xf32> to vector<320x32xf32>
    %2 = vector.extract_strided_slice %0 {offsets = [1, 0], sizes = [320, 32], strides = [1, 1]} : vector<360x32xf32> to vector<320x32xf32>
    %c0_1 = arith.constant 0 : index
    %c0_2 = arith.constant 0 : index
    %3 = vector.load %arg1[%c0_1, %c0_2] : memref<64x256xf32, #tpu.memory_space<vmem>>, vector<32x256xf32>
    %cst = arith.constant dense<0.000000e+00> : vector<320x256xf32>
    %4 = tpu.matmul %1, %3, %cst {dimension_numbers = #tpu.dot_dimension_numbers<[1], [0], [0], [1], [0, 0, 1, 1], [], []>} : vector<320x32xf32>, vector<32x256xf32>, vector<320x256xf32> -> vector<320x256xf32>
    %c32 = arith.constant 32 : index
    %c0_3 = arith.constant 0 : index
    %5 = vector.load %arg1[%c32, %c0_3] : memref<64x256xf32, #tpu.memory_space<vmem>>, vector<32x256xf32>
    %cst_4 = arith.constant dense<0.000000e+00> : vector<320x256xf32>
    %6 = tpu.matmul %2, %5, %cst_4 {dimension_numbers = #tpu.dot_dimension_numbers<[1], [0], [0], [1], [0, 0, 1, 1], [], []>} : vector<320x32xf32>, vector<32x256xf32>, vector<320x256xf32> -> vector<320x256xf32>
    %7 = arith.addf %4, %6 : vector<320x256xf32>
    %8 = vector.extract_strided_slice %7 {offsets = [0, 0], sizes = [320, 128], strides = [1, 1]} : vector<320x256xf32> to vector<320x128xf32>
    %9 = vector.extract_strided_slice %7 {offsets = [0, 128], sizes = [320, 128], strides = [1, 1]} : vector<320x256xf32> to vector<320x128xf32>
    %10 = vector.extract_strided_slice %8 {offsets = [0, 0], sizes = [160, 128], strides = [1, 1]} : vector<320x128xf32> to vector<160x128xf32>
    %11 = vector.extract_strided_slice %9 {offsets = [0, 0], sizes = [160, 128], strides = [1, 1]} : vector<320x128xf32> to vector<160x128xf32>
    %12 = arith.mulf %10, %10 : vector<160x128xf32>
    %13 = arith.mulf %11, %11 : vector<160x128xf32>
    %14 = arith.addf %12, %13 : vector<160x128xf32>
    %c0_5 = arith.constant 0 : index
    %c0_6 = arith.constant 0 : index
    %15 = vector.load %arg4[%c0_5, %c0_6] : memref<560x128xf32, #tpu.memory_space<vmem>>, vector<160x128xf32>
    tpu.vector_store %arg4[%c0_5, %c0_6], %14 {strides = array<i32>} : memref<560x128xf32, #tpu.memory_space<vmem>>, vector<160x128xf32>,
    %16 = vector.extract_strided_slice %10 {offsets = [0, 0], sizes = [40, 128], strides = [1, 1]} : vector<160x128xf32> to vector<40x128xf32>
    %17 = vector.extract_strided_slice %11 {offsets = [0, 0], sizes = [40, 128], strides = [1, 1]} : vector<160x128xf32> to vector<40x128xf32>
    %18 = vector.extract_strided_slice %10 {offsets = [40, 0], sizes = [40, 128], strides = [1, 1]} : vector<160x128xf32> to vector<40x128xf32>
    %19 = arith.mulf %16, %18 : vector<40x128xf32>
    %20 = vector.extract_strided_slice %11 {offsets = [40, 0], sizes = [40, 128], strides = [1, 1]} : vector<160x128xf32> to vector<40x128xf32>
    %21 = arith.mulf %17, %20 : vector<40x128xf32>
    %22 = arith.addf %19, %21 : vector<40x128xf32>
    %23 = vector.extract_strided_slice %10 {offsets = [80, 0], sizes = [40, 128], strides = [1, 1]} : vector<160x128xf32> to vector<40x128xf32>
    %24 = arith.mulf %16, %23 : vector<40x128xf32>
    %25 = vector.extract_strided_slice %11 {offsets = [80, 0], sizes = [40, 128], strides = [1, 1]} : vector<160x128xf32> to vector<40x128xf32>
    %26 = arith.mulf %17, %25 : vector<40x128xf32>
    %27 = arith.addf %24, %26 : vector<40x128xf32>
    %28 = vector.extract_strided_slice %10 {offsets = [120, 0], sizes = [40, 128], strides = [1, 1]} : vector<160x128xf32> to vector<40x128xf32>
    %29 = arith.mulf %16, %28 : vector<40x128xf32>
    %30 = vector.extract_strided_slice %11 {offsets = [120, 0], sizes = [40, 128], strides = [1, 1]} : vector<160x128xf32> to vector<40x128xf32>
    %31 = arith.mulf %17, %30 : vector<40x128xf32>
    %32 = arith.addf %29, %31 : vector<40x128xf32>
    %33 = arith.mulf %22, %22 : vector<40x128xf32>
    %34 = arith.mulf %27, %27 : vector<40x128xf32>
    %35 = arith.addf %33, %34 : vector<40x128xf32>
    %36 = arith.mulf %32, %32 : vector<40x128xf32>
    %37 = arith.addf %35, %36 : vector<40x128xf32>
    %38 = math.sqrt %37 : vector<40x128xf32>
    %cst_7 = arith.constant 1.1920929E-7 : f32
    %39 = vector.broadcast %cst_7 : f32 to vector<40x128xf32>
    %40 = arith.addf %38, %39 : vector<40x128xf32>
    %cst_8 = arith.constant 1.000000e+00 : f32
    %41 = vector.broadcast %cst_8 : f32 to vector<40x128xf32>
    %42 = arith.divf %41, %40 : vector<40x128xf32>
    %43 = arith.mulf %22, %42 : vector<40x128xf32>
    %c160 = arith.constant 160 : index
    %c0_9 = arith.constant 0 : index
    %44 = vector.load %arg4[%c160, %c0_9] : memref<560x128xf32, #tpu.memory_space<vmem>>, vector<40x128xf32>
    tpu.vector_store %arg4[%c160, %c0_9], %43 {strides = array<i32>} : memref<560x128xf32, #tpu.memory_space<vmem>>, vector<40x128xf32>,
    %45 = arith.mulf %27, %42 : vector<40x128xf32>
    %c200 = arith.constant 200 : index
    %c0_10 = arith.constant 0 : index
    %46 = vector.load %arg4[%c200, %c0_10] : memref<560x128xf32, #tpu.memory_space<vmem>>, vector<40x128xf32>
    tpu.vector_store %arg4[%c200, %c0_10], %45 {strides = array<i32>} : memref<560x128xf32, #tpu.memory_space<vmem>>, vector<40x128xf32>,
    %47 = arith.mulf %32, %42 : vector<40x128xf32>
    %c240 = arith.constant 240 : index
    %c0_11 = arith.constant 0 : index
    %48 = vector.load %arg4[%c240, %c0_11] : memref<560x128xf32, #tpu.memory_space<vmem>>, vector<40x128xf32>
    tpu.vector_store %arg4[%c240, %c0_11], %47 {strides = array<i32>} : memref<560x128xf32, #tpu.memory_space<vmem>>, vector<40x128xf32>,
    %49 = vector.extract_strided_slice %8 {offsets = [160, 0], sizes = [160, 128], strides = [1, 1]} : vector<320x128xf32> to vector<160x128xf32>
    %50 = vector.extract_strided_slice %9 {offsets = [160, 0], sizes = [160, 128], strides = [1, 1]} : vector<320x128xf32> to vector<160x128xf32>
    %51 = arith.mulf %49, %49 : vector<160x128xf32>
    %52 = arith.mulf %50, %50 : vector<160x128xf32>
    %53 = arith.addf %51, %52 : vector<160x128xf32>
    %c280 = arith.constant 280 : index
    %c0_12 = arith.constant 0 : index
    %54 = vector.load %arg4[%c280, %c0_12] : memref<560x128xf32, #tpu.memory_space<vmem>>, vector<160x128xf32>
    tpu.vector_store %arg4[%c280, %c0_12], %53 {strides = array<i32>} : memref<560x128xf32, #tpu.memory_space<vmem>>, vector<160x128xf32>,
    %55 = vector.extract_strided_slice %49 {offsets = [0, 0], sizes = [40, 128], strides = [1, 1]} : vector<160x128xf32> to vector<40x128xf32>
    %56 = vector.extract_strided_slice %50 {offsets = [0, 0], sizes = [40, 128], strides = [1, 1]} : vector<160x128xf32> to vector<40x128xf32>
    %57 = vector.extract_strided_slice %49 {offsets = [40, 0], sizes = [40, 128], strides = [1, 1]} : vector<160x128xf32> to vector<40x128xf32>
    %58 = arith.mulf %55, %57 : vector<40x128xf32>
    %59 = vector.extract_strided_slice %50 {offsets = [40, 0], sizes = [40, 128], strides = [1, 1]} : vector<160x128xf32> to vector<40x128xf32>
    %60 = arith.mulf %56, %59 : vector<40x128xf32>
    %61 = arith.addf %58, %60 : vector<40x128xf32>
    %62 = vector.extract_strided_slice %49 {offsets = [80, 0], sizes = [40, 128], strides = [1, 1]} : vector<160x128xf32> to vector<40x128xf32>
    %63 = arith.mulf %55, %62 : vector<40x128xf32>
    %64 = vector.extract_strided_slice %50 {offsets = [80, 0], sizes = [40, 128], strides = [1, 1]} : vector<160x128xf32> to vector<40x128xf32>
    %65 = arith.mulf %56, %64 : vector<40x128xf32>
    %66 = arith.addf %63, %65 : vector<40x128xf32>
    %67 = vector.extract_strided_slice %49 {offsets = [120, 0], sizes = [40, 128], strides = [1, 1]} : vector<160x128xf32> to vector<40x128xf32>
    %68 = arith.mulf %55, %67 : vector<40x128xf32>
    %69 = vector.extract_strided_slice %50 {offsets = [120, 0], sizes = [40, 128], strides = [1, 1]} : vector<160x128xf32> to vector<40x128xf32>
    %70 = arith.mulf %56, %69 : vector<40x128xf32>
    %71 = arith.addf %68, %70 : vector<40x128xf32>
    %72 = arith.mulf %61, %61 : vector<40x128xf32>
    %73 = arith.mulf %66, %66 : vector<40x128xf32>
    %74 = arith.addf %72, %73 : vector<40x128xf32>
    %75 = arith.mulf %71, %71 : vector<40x128xf32>
    %76 = arith.addf %74, %75 : vector<40x128xf32>
    %77 = math.sqrt %76 : vector<40x128xf32>
    %cst_13 = arith.constant 1.1920929E-7 : f32
    %78 = vector.broadcast %cst_13 : f32 to vector<40x128xf32>
    %79 = arith.addf %77, %78 : vector<40x128xf32>
    %cst_14 = arith.constant 1.000000e+00 : f32
    %80 = vector.broadcast %cst_14 : f32 to vector<40x128xf32>
    %81 = arith.divf %80, %79 : vector<40x128xf32>
    %82 = arith.mulf %61, %81 : vector<40x128xf32>
    %c440 = arith.constant 440 : index
    %c0_15 = arith.constant 0 : index
    %83 = vector.load %arg4[%c440, %c0_15] : memref<560x128xf32, #tpu.memory_space<vmem>>, vector<40x128xf32>
    tpu.vector_store %arg4[%c440, %c0_15], %82 {strides = array<i32>} : memref<560x128xf32, #tpu.memory_space<vmem>>, vector<40x128xf32>,
    %84 = arith.mulf %66, %81 : vector<40x128xf32>
    %c480 = arith.constant 480 : index
    %c0_16 = arith.constant 0 : index
    %85 = vector.load %arg4[%c480, %c0_16] : memref<560x128xf32, #tpu.memory_space<vmem>>, vector<40x128xf32>
    tpu.vector_store %arg4[%c480, %c0_16], %84 {strides = array<i32>} : memref<560x128xf32, #tpu.memory_space<vmem>>, vector<40x128xf32>,
    %86 = arith.mulf %71, %81 : vector<40x128xf32>
    %c520 = arith.constant 520 : index
    %c0_17 = arith.constant 0 : index
    %87 = vector.load %arg4[%c520, %c0_17] : memref<560x128xf32, #tpu.memory_space<vmem>>, vector<40x128xf32>
    tpu.vector_store %arg4[%c520, %c0_17], %86 {strides = array<i32>} : memref<560x128xf32, #tpu.memory_space<vmem>>, vector<40x128xf32>,
    %c0_18 = arith.constant 0 : index
    %c0_19 = arith.constant 0 : index
    %88 = vector.load %arg4[%c0_18, %c0_19] : memref<560x128xf32, #tpu.memory_space<vmem>>, vector<560x128xf32>
    %c0_20 = arith.constant 0 : index
    %c0_21 = arith.constant 0 : index
    %89 = vector.load %arg2[%c0_20, %c0_21] : memref<128x128xf32, #tpu.memory_space<vmem>>, vector<128x128xf32>
    %cst_22 = arith.constant dense<0.000000e+00> : vector<560x128xf32>
    %90 = tpu.matmul %88, %89, %cst_22 {dimension_numbers = #tpu.dot_dimension_numbers<[1], [0], [0], [1], [0, 0, 1, 1], [], []>} : vector<560x128xf32>, vector<128x128xf32>, vector<560x128xf32> -> vector<560x128xf32>
    %91 = vector.extract_strided_slice %90 {offsets = [0, 0], sizes = [160, 128], strides = [1, 1]} : vector<560x128xf32> to vector<160x128xf32>
    %cst_23 = arith.constant 1.000000e-10 : f32
    %92 = vector.broadcast %cst_23 : f32 to vector<160x128xf32>
    %93 = arith.maximumf %91, %92 : vector<160x128xf32>
    %94 = math.log %93 : vector<160x128xf32>
    %cst_24 = arith.constant 0.434294492 : f32
    %95 = vector.broadcast %cst_24 : f32 to vector<160x128xf32>
    %96 = arith.mulf %94, %95 : vector<160x128xf32>
    %cst_25 = arith.constant 1.000000e+01 : f32
    %97 = vector.broadcast %cst_25 : f32 to vector<160x128xf32>
    %98 = arith.mulf %97, %96 : vector<160x128xf32>
    %cst_26 = arith.constant 0.000000e+00 : f32
    %99 = vector.broadcast %cst_26 : f32 to vector<160x128xf32>
    %100 = arith.subf %98, %99 : vector<160x128xf32>
    %c0_27 = arith.constant 0 : index
    %c0_28 = arith.constant 0 : index
    %101 = vector.load %arg3[%c0_27, %c0_28] : memref<560x128xf32, #tpu.memory_space<vmem>>, vector<160x128xf32>
    tpu.vector_store %arg3[%c0_27, %c0_28], %100 {strides = array<i32>} : memref<560x128xf32, #tpu.memory_space<vmem>>, vector<160x128xf32>,
    %102 = vector.extract_strided_slice %90 {offsets = [160, 0], sizes = [120, 128], strides = [1, 1]} : vector<560x128xf32> to vector<120x128xf32>
    %c160_29 = arith.constant 160 : index
    %c0_30 = arith.constant 0 : index
    %103 = vector.load %arg3[%c160_29, %c0_30] : memref<560x128xf32, #tpu.memory_space<vmem>>, vector<120x128xf32>
    tpu.vector_store %arg3[%c160_29, %c0_30], %102 {strides = array<i32>} : memref<560x128xf32, #tpu.memory_space<vmem>>, vector<120x128xf32>,
    %104 = vector.extract_strided_slice %90 {offsets = [280, 0], sizes = [160, 128], strides = [1, 1]} : vector<560x128xf32> to vector<160x128xf32>
    %cst_31 = arith.constant 1.000000e-10 : f32
    %105 = vector.broadcast %cst_31 : f32 to vector<160x128xf32>
    %106 = arith.maximumf %104, %105 : vector<160x128xf32>
    %107 = math.log %106 : vector<160x128xf32>
    %cst_32 = arith.constant 0.434294492 : f32
    %108 = vector.broadcast %cst_32 : f32 to vector<160x128xf32>
    %109 = arith.mulf %107, %108 : vector<160x128xf32>
    %cst_33 = arith.constant 1.000000e+01 : f32
    %110 = vector.broadcast %cst_33 : f32 to vector<160x128xf32>
    %111 = arith.mulf %110, %109 : vector<160x128xf32>
    %cst_34 = arith.constant 0.000000e+00 : f32
    %112 = vector.broadcast %cst_34 : f32 to vector<160x128xf32>
    %113 = arith.subf %111, %112 : vector<160x128xf32>
    %c280_35 = arith.constant 280 : index
    %c0_36 = arith.constant 0 : index
    %114 = vector.load %arg3[%c280_35, %c0_36] : memref<560x128xf32, #tpu.memory_space<vmem>>, vector<160x128xf32>
    tpu.vector_store %arg3[%c280_35, %c0_36], %113 {strides = array<i32>} : memref<560x128xf32, #tpu.memory_space<vmem>>, vector<160x128xf32>,
    %115 = vector.extract_strided_slice %90 {offsets = [440, 0], sizes = [120, 128], strides = [1, 1]} : vector<560x128xf32> to vector<120x128xf32>
    %c440_37 = arith.constant 440 : index
    %c0_38 = arith.constant 0 : index
    %116 = vector.load %arg3[%c440_37, %c0_38] : memref<560x128xf32, #tpu.memory_space<vmem>>, vector<120x128xf32>
    tpu.vector_store %arg3[%c440_37, %c0_38], %115 {strides = array<i32>} : memref<560x128xf32, #tpu.memory_space<vmem>>, vector<120x128xf32>,
    return
  }
}

</mosaic_0001>

<bundles_post_ra>
// kernel: tpu_custom_call.1
= control target key start
LH: loop header
LB: loop body
LE: loop exit
PB: predicated region body
PF: predicated region fallthrough
CT: control target
= control target key end

     0   :  { %v2796_v7 = vmov 0.0   ;;  %vm113_vm0 = vcmask 1046528   ;;  %vm195_vm1 = vcmask 261120   ;;  %s3965_s0 = inlined_call_operand.vmem [shape: f32[360,32], index: 0, kind: input, shape index: {}]   ;;  %s3966_s1 = inlined_call_operand.vmem [shape: f32[64,256], index: 1, kind: input, shape index: {}]   ;;  %s3967_s2 = inlined_call_operand.vmem [shape: f32[128,128], index: 2, kind: input, shape index: {}]   ;;  %s3968_s3 = inlined_call_operand.hbm [shape: f32[560,128], index: 3, kind: output, shape index: {}]  }
   0x1   :  { %v65_v0 = vld [vmem:[%s3966_s1 + $0x48] sm:$0xff]  ;;  %v67_v1 = vld [vmem:[%s3966_s1 + $0x58] sm:$0xff]  ;;  %v64_v2 = vld [vmem:[%s3966_s1 + $0x40] sm:$0xff]  ;;  %340 = vmatprep.mubr.f32.mxu0 %v2796_v7  ;;  %448 = vmatprep.mubr.f32.mxu1 %v2796_v7 }
   0x2   :  { %v2516_v3 = vpack.c.bf16 %v67_v1, %v65_v0  ;;  %v66_v4 = vld [vmem:[%s3966_s1 + $0x50] sm:$0xff]  ;;  %v69_v5 = vld [vmem:[%s3966_s1 + $0x68] sm:$0xff]  ;;  %v71_v6 = vld [vmem:[%s3966_s1 + $0x78] sm:$0xff] }
   0x3   :  { %v2518_v8 = vpack.c.bf16 %v66_v4, %v64_v2  ;;  %v2520_v9 = vpack.c.bf16 %v71_v6, %v69_v5  ;;  %v68_v10 = vld [vmem:[%s3966_s1 + $0x60] sm:$0xff]  ;;  %v70_v11 = vld [vmem:[%s3966_s1 + $0x70] sm:$0xff]  ;;  %v2854_v13 = vld [vmem:[%s3965_s0 + $0x8] sm:$0xff] }
   0x4   :  { %v2849_v12 = vld [vmem:[%s3965_s0] sm:$0xff]  ;;  %2517 = vmatprep.subr.bf16.mxu0 %v2516_v3  ;;  %v57_v14 = vld [vmem:[%s3966_s1 + $0x8] sm:$0xff]  ;;  %v59_v15 = vld [vmem:[%s3966_s1 + $0x18] sm:$0xff]  ;;  %2564 = vmatprep.subr.bf16.mxu1 %v2516_v3  ;;  %v2522_v16 = vpack.c.bf16 %v70_v11, %v68_v10  ;;  %v115_v18 = vrot.slane %v2854_v13, 1 }
   0x5   :  { %2519 = vmatpush1.bf16.msra.mxu0 %v2518_v8  ;;  %v114_v17 = vrot.slane %v2849_v12, 1  ;;  %2566 = vmatpush1.bf16.msra.mxu1 %v2518_v8  ;;  %v2524_v19 = vpack.c.bf16 %v59_v15, %v57_v14  ;;  %v56_v20 = vld [vmem:[%s3966_s1] sm:$0xff]  ;;  %v58_v21 = vld [vmem:[%s3966_s1 + $0x10] sm:$0xff]  ;;  %v61_v23 = vld [vmem:[%s3966_s1 + $0x28] sm:$0xff] }
   0x6   :  { %2521 = vmatprep.subr.bf16.mxu0 %v2520_v9  ;;  %v2873_v22 = vld [vmem:[%s3965_s0 + $0x10] sm:$0xff]  ;;  %2565 = vmatprep.subr.bf16.mxu1 %v2520_v9  ;;  %v2526_v25 = vpack.c.bf16 %v58_v21, %v56_v20  ;;  %v63_v27 = vld [vmem:[%s3966_s1 + $0x38] sm:$0xff]  ;;  %v60_v29 = vld [vmem:[%s3966_s1 + $0x20] sm:$0xff] }
   0x7   :  { %v116_v24 = vsel %vm113_vm0, %v114_v17, %v115_v18  ;;  %v117_v26 = vrot.slane %v2873_v22, 1  ;;  %v2886_v28 = vld [vmem:[%s3965_s0 + $0x18] sm:$0xff]  ;;  %v62_v30 = vld [vmem:[%s3966_s1 + $0x30] sm:$0xff]  ;;  %v2528_v31 = vpack.c.bf16 %v63_v27, %v61_v23 }
   0x8   :  { %v119_v33 = vrot.slane %v2886_v28, 1  ;;  %v2530_v34 = vpack.c.bf16 %v62_v30, %v60_v29 }
   0x9   :  { %2523 = vmatpush1.bf16.msra.mxu0 %v2522_v16  ;;  %2567 = vmatpush1.bf16.msra.mxu1 %v2522_v16  ;;  %v118_v32 = vsel %vm113_vm0, %v115_v18, %v117_v26 }
   0xa   :  { %2525 = vmatprep.subr.bf16.mxu0 %v2524_v19 }
   0xc   :  { %2213 = vmatmul.mubr.msk.f32.vlgmr.msra.gmra.mrb[0].mxu0 %vm195_vm1, %v116_v24 }
   0xd   :  { %2527 = vmatpush1.bf16.msra.mxu0 %v2526_v25  ;;  %346 = vmatprep.mubr.f32.mxu0 %v2796_v7 }
   0xe   :  { %8 = vsyncpa [#allocation4], 0  ;;  %v2901_v35 = vld [vmem:[%s3965_s0 + $0x20] sm:$0xff]  ;;  %2529 = vmatprep.subr.bf16.mxu0 %v2528_v31  ;;  %v120_v36 = vsel %vm113_vm0, %v117_v26, %v119_v33  ;;  %v2910_v38 = vld [vmem:[%s3965_s0 + $0x28] sm:$0xff] }
   0xf   :  { %v121_v37 = vrot.slane %v2901_v35, 1  ;;  %v123_v40 = vrot.slane %v2910_v38, 1  ;;  %v2919_v41 = vld [vmem:[%s3965_s0 + $0x90] sm:$0xff]  ;;  %v2929_v43 = vld [vmem:[%s3965_s0 + $0x98] sm:$0xff]  ;;  %v2949_v50 = vld [vmem:[%s3965_s0 + $0xa0] sm:$0xff] }
  0x10   :  { %2214 = vmatmul.mubr.msk.f32.gmra.mrb[2].mxu0 %vm195_vm1, %v118_v32  ;;  %v2924_v42 = vld [vmem:[%s3965_s0 + $0x30] sm:$0xff]  ;;  %v149_v44 = vrot.slane %v2919_v41, 1  ;;  %v151_v45 = vrot.slane %v2929_v43, 1  ;;  %v2940_v48 = vld [vmem:[%s3965_s0 + $0x38] sm:$0xff]  ;;  %v153_v51 = vrot.slane %v2949_v50, 1  ;;  %v2960_v54 = vld [vmem:[%s3965_s0 + $0x40] sm:$0xff] }
  0x11   :  { %352 = vmatprep.mubr.f32.mxu0 %v2796_v7  ;;  %2531 = vmatpush1.bf16.msra.mxu0 %v2530_v34  ;;  %v122_v39 = vsel %vm113_vm0, %v119_v33, %v121_v37  ;;  %v124_v46 = vsel %vm113_vm0, %v121_v37, %v123_v40  ;;  %v125_v47 = vrot.slane %v2924_v42, 1  ;;  %v127_v53 = vrot.slane %v2940_v48, 1  ;;  %v2967_v56 = vld [vmem:[%s3965_s0 + $0xa8] sm:$0xff]  ;;  %v2985_v62 = vld [vmem:[%s3965_s0 + $0xb0] sm:$0xff]  ;;  %v3003_v4 = vld [vmem:[%s3965_s0 + $0xb8] sm:$0xff] }
  0x12   :  { %v152_v49 = vsel %vm113_vm0, %v149_v44, %v151_v45  ;;  %v154_v55 = vsel %vm113_vm0, %v151_v45, %v153_v51  ;;  %v155_v57 = vrot.slane %v2967_v56, 1  ;;  %v129_v59 = vrot.slane %v2960_v54, 1  ;;  %v2978_v60 = vld [vmem:[%s3965_s0 + $0x48] sm:$0xff]  ;;  %v2996_v2 = vld [vmem:[%s3965_s0 + $0x50] sm:$0xff]  ;;  %v3014_v9 = vld [vmem:[%s3965_s0 + $0x58] sm:$0xff] }
  0x13   :  { %2231 = vmatmul.mubr.msk.f32.vlgmr.msra.gmra.mrb[0].mxu1 %vm195_vm1, %v152_v49  ;;  %v126_v52 = vsel %vm113_vm0, %v123_v40, %v125_v47  ;;  %v128_v58 = vsel %vm113_vm0, %v125_v47, %v127_v53  ;;  %v157_v63 = vrot.slane %v2985_v62, 1  ;;  %v131_v1 = vrot.slane %v2978_v60, 1  ;;  %v3021_v11 = vld [vmem:[%s3965_s0 + $0xc0] sm:$0xff]  ;;  %v3039_v19 = vld [vmem:[%s3965_s0 + $0xc8] sm:$0xff]  ;;  %v3057_v26 = vld [vmem:[%s3965_s0 + $0xd0] sm:$0xff] }
  0x14   :  { %2215 = vmatmul.mubr.msk.f32.gmra.mrb[4].mxu0 %vm195_vm1, %v120_v36  ;;  %454 = vmatprep.mubr.f32.mxu1 %v2796_v7  ;;  %v156_v61 = vsel %vm113_vm0, %v153_v51, %v155_v57  ;;  %v130_v0 = vsel %vm113_vm0, %v127_v53, %v129_v59  ;;  %v159_v5 = vrot.slane %v3003_v4, 1  ;;  %v133_v8 = vrot.slane %v2996_v2, 1  ;;  %v3032_v17 = vld [vmem:[%s3965_s0 + $0x60] sm:$0xff]  ;;  %v3050_v24 = vld [vmem:[%s3965_s0 + $0x68] sm:$0xff]  ;;  %v3068_v31 = vld [vmem:[%s3965_s0 + $0x70] sm:$0xff] }
  0x15   :  { %358 = vmatprep.mubr.f32.mxu0 %v2796_v7  ;;  %v158_v3 = vsel %vm113_vm0, %v155_v57, %v157_v63  ;;  %v132_v6 = vsel %vm113_vm0, %v129_v59, %v131_v1  ;;  %v161_v14 = vrot.slane %v3021_v11, 1  ;;  %v135_v16 = vrot.slane %v3014_v9, 1  ;;  %v3075_v33 = vld [vmem:[%s3965_s0 + $0xd8] sm:$0xff]  ;;  %v3093_v45 = vld [vmem:[%s3965_s0 + $0xe0] sm:$0xff]  ;;  %v3111_v53 = vld [vmem:[%s3965_s0 + $0xe8] sm:$0xff] }
  0x16   :  { %v160_v10 = vsel %vm113_vm0, %v157_v63, %v159_v5  ;;  %v134_v15 = vsel %vm113_vm0, %v131_v1, %v133_v8  ;;  %v163_v20 = vrot.slane %v3039_v19, 1  ;;  %v137_v23 = vrot.slane %v3032_v17, 1  ;;  %v3104_v51 = vld [vmem:[%s3965_s0 + $0x80] sm:$0xff]  ;;  %v3122_v59 = vld [vmem:[%s3965_s0 + $0x88] sm:$0xff]  ;;  %v3129_v63 = vld [vmem:[%s3965_s0 + $0xf0] sm:$0xff] }
  0x17   :  { %2232 = vmatmul.mubr.msk.f32.gmra.mrb[2].mxu1 %vm195_vm1, %v154_v55  ;;  %v162_v18 = vsel %vm113_vm0, %v159_v5, %v161_v14  ;;  %v136_v21 = vsel %vm113_vm0, %v133_v8, %v135_v16  ;;  %v165_v27 = vrot.slane %v3057_v26, 1  ;;  %v139_v30 = vrot.slane %v3050_v24, 1 }
  0x18   :  { %2216 = vmatmul.mubr.msk.f32.gmra.mrb[6].mxu0 %vm195_vm1, %v122_v39  ;;  %460 = vmatprep.mubr.f32.mxu1 %v2796_v7  ;;  %v164_v25 = vsel %vm113_vm0, %v161_v14, %v163_v20  ;;  %v138_v29 = vsel %vm113_vm0, %v135_v16, %v137_v23  ;;  %v167_v34 = vrot.slane %v3075_v33, 1  ;;  %v141_v37 = vrot.slane %v3068_v31, 1  ;;  %v3086_v39 = vld [vmem:[%s3965_s0 + $0x78] sm:$0xff] }
  0x19   :  { %364 = vmatprep.mubr.f32.mxu0 %v2796_v7  ;;  %v166_v32 = vsel %vm113_vm0, %v163_v20, %v165_v27  ;;  %v140_v36 = vsel %vm113_vm0, %v137_v23, %v139_v30  ;;  %v143_v49 = vrot.slane %v3086_v39, 1  ;;  %v171_v55 = vrot.slane %v3111_v53, 1 }
  0x1a   :  { %v168_v40 = vsel %vm113_vm0, %v165_v27, %v167_v34  ;;  %v142_v47 = vsel %vm113_vm0, %v139_v30, %v141_v37  ;;  %v3191_v30 = vld [vmem:[%s3965_s0 + $0x118] sm:$0xff] }
  0x1b   :  { %2233 = vmatmul.mubr.msk.f32.gmra.mrb[4].mxu1 %vm195_vm1, %v156_v61  ;;  %v144_v57 = vsel %vm113_vm0, %v141_v37, %v143_v49  ;;  %v3215_v37 = vld [vmem:[%s3965_s0 + $0x128] sm:$0xff] }
  0x1c   :  { %2217 = vmatmul.mubr.msk.f32.gmra.mrb[8].mxu0 %vm195_vm1, %v124_v46  ;;  %466 = vmatprep.mubr.f32.mxu1 %v2796_v7  ;;  %v169_v46 = vrot.slane %v3093_v45, 1 }
  0x1d   :  { %370 = vmatprep.mubr.f32.mxu0 %v2796_v7 }
  0x1e   :  { %v172_v61 = vsel %vm113_vm0, %v169_v46, %v171_v55 }
  0x1f   :  { %2234 = vmatmul.mubr.msk.f32.gmra.mrb[6].mxu1 %vm195_vm1, %v158_v3  ;;  %v147_v3 = vrot.slane %v3122_v59, 1 }
  0x20   :  { %2218 = vmatmul.mubr.msk.f32.gmra.mrb[10].mxu0 %vm195_vm1, %v126_v52  ;;  %472 = vmatprep.mubr.f32.mxu1 %v2796_v7  ;;  %v170_v52 = vsel %vm113_vm0, %v167_v34, %v169_v46  ;;  %v3203_v34 = vld [vmem:[%s3965_s0 + $0x120] sm:$0xff]  ;;  %v3227_v46 = vld [vmem:[%s3965_s0 + $0x130] sm:$0xff] }
  0x21   :  { %376 = vmatprep.mubr.f32.mxu0 %v2796_v7 }
  0x23   :  { %2235 = vmatmul.mubr.msk.f32.gmra.mrb[8].mxu1 %vm195_vm1, %v160_v10 }
  0x24   :  { %2219 = vmatmul.mubr.msk.f32.gmra.mrb[12].mxu0 %vm195_vm1, %v128_v58  ;;  %478 = vmatprep.mubr.f32.mxu1 %v2796_v7  ;;  %v145_v58 = vrot.slane %v3104_v51, 1 }
  0x25   :  { %382 = vmatprep.mubr.f32.mxu0 %v2796_v7 }
  0x26   :  { %v146_v1 = vsel %vm113_vm0, %v143_v49, %v145_v58  ;;  %v148_v10 = vsel %vm113_vm0, %v145_v58, %v147_v3  ;;  %v3239_v49 = vld [vmem:[%s3965_s0 + $0x138] sm:$0xff]  ;;  %v1496_v58 = vld [vmem:[%s3967_s2] sm:$0xff] }
  0x27   :  { %2236 = vmatmul.mubr.msk.f32.gmra.mrb[10].mxu1 %vm195_vm1, %v162_v18  ;;  %v150_v18 = vsel %vm113_vm0, %v147_v3, %v149_v44  ;;  %v3179_v44 = vld [vmem:[%s3965_s0 + $0x110] sm:$0xff]  ;;  %v1500_v3 = vld [vmem:[%s3967_s2 + $0x20] sm:$0xff] }
  0x28   :  { %2220 = vmatmul.mubr.msk.f32.gmra.mrb[14].mxu0 %vm195_vm1, %v130_v0  ;;  %484 = vmatprep.mubr.f32.mxu1 %v2796_v7  ;;  %v173_v0 = vrot.slane %v3129_v63, 1  ;;  %v181_v27 = vrot.slane %v3179_v44, 1 }
  0x29   :  { %388 = vmatprep.mubr.f32.mxu0 %v2796_v7 }
  0x2a   :  { %v174_v5 = vsel %vm113_vm0, %v171_v55, %v173_v0  ;;  %v55_v55 = vld [vmem:[%s3965_s0 + $0x140] sm:$0xff] }
  0x2b   :  { %2237 = vmatmul.mubr.msk.f32.gmra.mrb[12].mxu1 %vm195_vm1, %v164_v25 }
  0x2c   :  { %2221 = vmatmul.mubr.msk.f32.gmra.mrb[16].mxu0 %vm195_vm1, %v132_v6  ;;  %490 = vmatprep.mubr.f32.mxu1 %v2796_v7  ;;  %v3142_v6 = vld [vmem:[%s3965_s0 + $0xf8] sm:$0xff] }
  0x2d   :  { %394 = vmatprep.mubr.f32.mxu0 %v2796_v7  ;;  %v175_v8 = vrot.slane %v3142_v6, 1 }
  0x2f   :  { %2238 = vmatmul.mubr.msk.f32.gmra.mrb[14].mxu1 %vm195_vm1, %v166_v32  ;;  %v176_v14 = vsel %vm113_vm0, %v173_v0, %v175_v8 }
  0x30   :  { %2222 = vmatmul.mubr.msk.f32.gmra.mrb[18].mxu0 %vm195_vm1, %v134_v15  ;;  %496 = vmatprep.mubr.f32.mxu1 %v2796_v7  ;;  %v3154_v15 = vld [vmem:[%s3965_s0 + $0x100] sm:$0xff] }
  0x31   :  { %400 = vmatprep.mubr.f32.mxu0 %v2796_v7  ;;  %v177_v16 = vrot.slane %v3154_v15, 1 }
  0x33   :  { %2239 = vmatmul.mubr.msk.f32.gmra.mrb[16].mxu1 %vm195_vm1, %v168_v40  ;;  %v178_v20 = vsel %vm113_vm0, %v175_v8, %v177_v16 }
  0x34   :  { %2223 = vmatmul.mubr.msk.f32.gmra.mrb[20].mxu0 %vm195_vm1, %v136_v21  ;;  %502 = vmatprep.mubr.f32.mxu1 %v2796_v7  ;;  %v3168_v21 = vld [vmem:[%s3965_s0 + $0x108] sm:$0xff] }
  0x35   :  { %406 = vmatprep.mubr.f32.mxu0 %v2796_v7  ;;  %v179_v23 = vrot.slane %v3168_v21, 1 }
  0x37   :  { %2240 = vmatmul.mubr.msk.f32.gmra.mrb[18].mxu1 %vm195_vm1, %v170_v52  ;;  %v180_v25 = vsel %vm113_vm0, %v177_v16, %v179_v23  ;;  %v1504_v16 = vld [vmem:[%s3967_s2 + $0x40] sm:$0xff] }
  0x38   :  { %2224 = vmatmul.mubr.msk.f32.gmra.mrb[22].mxu0 %vm195_vm1, %v138_v29  ;;  %508 = vmatprep.mubr.f32.mxu1 %v2796_v7  ;;  %v182_v29 = vsel %vm113_vm0, %v179_v23, %v181_v27  ;;  %v1507_v23 = vld [vmem:[%s3967_s2 + $0x58] sm:$0xff] }
  0x39   :  { %412 = vmatprep.mubr.f32.mxu0 %v2796_v7 }
  0x3b   :  { %2241 = vmatmul.mubr.msk.f32.gmra.mrb[20].mxu1 %vm195_vm1, %v172_v61  ;;  %v1498_v61 = vld [vmem:[%s3967_s2 + $0x10] sm:$0xff] }
  0x3c   :  { %2225 = vmatmul.mubr.msk.f32.gmra.mrb[24].mxu0 %vm195_vm1, %v140_v36  ;;  %514 = vmatprep.mubr.f32.mxu1 %v2796_v7 }
  0x3d   :  { %418 = vmatprep.mubr.f32.mxu0 %v2796_v7 }
  0x3f   :  { %2242 = vmatmul.mubr.msk.f32.gmra.mrb[22].mxu1 %vm195_vm1, %v174_v5  ;;  %v1501_v5 = vld [vmem:[%s3967_s2 + $0x28] sm:$0xff] }
  0x40   :  { %2226 = vmatmul.mubr.msk.f32.gmra.mrb[26].mxu0 %vm195_vm1, %v142_v47  ;;  %520 = vmatprep.mubr.f32.mxu1 %v2796_v7  ;;  %v2540_v8 = vpack.c.bf16 %v1501_v5, %v1500_v3 }
  0x41   :  { %424 = vmatprep.mubr.f32.mxu0 %v2796_v7 }
  0x43   :  { %2243 = vmatmul.mubr.msk.f32.gmra.mrb[24].mxu1 %vm195_vm1, %v176_v14  ;;  %v1503_v14 = vld [vmem:[%s3967_s2 + $0x38] sm:$0xff] }
  0x44   :  { %2227 = vmatmul.mubr.msk.f32.gmra.mrb[28].mxu0 %vm195_vm1, %v144_v57  ;;  %526 = vmatprep.mubr.f32.mxu1 %v2796_v7 }
  0x45   :  { %430 = vmatprep.mubr.f32.mxu0 %v2796_v7 }
  0x47   :  { %2244 = vmatmul.mubr.msk.f32.gmra.mrb[26].mxu1 %vm195_vm1, %v178_v20  ;;  %v1506_v20 = vld [vmem:[%s3967_s2 + $0x50] sm:$0xff] }
  0x48   :  { %2228 = vmatmul.mubr.msk.f32.gmra.mrb[30].mxu0 %vm195_vm1, %v146_v1  ;;  %532 = vmatprep.mubr.f32.mxu1 %v2796_v7  ;;  %v1499_v1 = vld [vmem:[%s3967_s2 + $0x18] sm:$0xff] }
  0x49   :  { %436 = vmatprep.mubr.f32.mxu0 %v2796_v7 }
  0x4b   :  { %2245 = vmatmul.mubr.msk.f32.gmra.mrb[28].mxu1 %vm195_vm1, %v180_v25 }
  0x4c   :  { %2229 = vmatmul.mubr.msk.f32.gmra.mrb[32].mxu0 %vm195_vm1, %v148_v10  ;;  %538 = vmatprep.mubr.f32.mxu1 %v2796_v7  ;;  %v1502_v10 = vld [vmem:[%s3967_s2 + $0x30] sm:$0xff] }
  0x4d   :  { %442 = vmatprep.mubr.f32.mxu0 %v2796_v7 }
  0x4f   :  { %2246 = vmatmul.mubr.msk.f32.gmra.mrb[30].mxu1 %vm195_vm1, %v182_v29 }
  0x50   :  { %2230 = vmatmul.mubr.msk.f32.gmra.mrb[34].mxu0 %vm195_vm1, %v150_v18  ;;  %544 = vmatprep.mubr.f32.mxu1 %v2796_v7  ;;  %v1505_v18 = vld [vmem:[%s3967_s2 + $0x48] sm:$0xff] }
  0x51   :  { %725 = vmatprep.mubr.f32.mxu0 %v2796_v7 }
  0x54   :  { %2253 = vmatmul.mubr.msk.f32.vlgmr.msra.gmra.mrb[0].mxu0 %vm195_vm1, %v2849_v12  ;;  %v183_v12 = vrot.slane %v3191_v30, 1 }
  0x55   :  { %731 = vmatprep.mubr.f32.mxu0 %v2796_v7 }
  0x56   :  { %v184_v32 = vsel %vm113_vm0, %v181_v27, %v183_v12 }
  0x57   :  { %2247 = vmatmul.mubr.msk.f32.gmra.mrb[32].mxu1 %vm195_vm1, %v184_v32 }
  0x58   :  { %2254 = vmatmul.mubr.msk.f32.gmra.mrb[2].mxu0 %vm195_vm1, %v2854_v13  ;;  %550 = vmatprep.mubr.f32.mxu1 %v2796_v7  ;;  %v185_v13 = vrot.slane %v3203_v34, 1 }
  0x59   :  { %737 = vmatprep.mubr.f32.mxu0 %v2796_v7 }
  0x5a   :  { %v186_v36 = vsel %vm113_vm0, %v183_v12, %v185_v13 }
  0x5b   :  { %2248 = vmatmul.mubr.msk.f32.gmra.mrb[34].mxu1 %vm195_vm1, %v186_v36 }
  0x5c   :  { %2255 = vmatmul.mubr.msk.f32.gmra.mrb[4].mxu0 %vm195_vm1, %v2873_v22  ;;  %556 = vmatprep.mubr.f32.mxu1 %v2796_v7  ;;  %v187_v22 = vrot.slane %v3215_v37, 1 }
  0x5d   :  { %743 = vmatprep.mubr.f32.mxu0 %v2796_v7 }
  0x5e   :  { %v188_v40 = vsel %vm113_vm0, %v185_v13, %v187_v22 }
  0x5f   :  { %2249 = vmatmul.mubr.msk.f32.gmra.mrb[36].mxu1 %vm195_vm1, %v188_v40 }
  0x60   :  { %2256 = vmatmul.mubr.msk.f32.gmra.mrb[6].mxu0 %vm195_vm1, %v2886_v28  ;;  %562 = vmatprep.mubr.f32.mxu1 %v2796_v7  ;;  %v189_v28 = vrot.slane %v3227_v46, 1 }
  0x61   :  { %749 = vmatprep.mubr.f32.mxu0 %v2796_v7 }
  0x62   :  { %v190_v47 = vsel %vm113_vm0, %v187_v22, %v189_v28 }
  0x63   :  { %2250 = vmatmul.mubr.msk.f32.gmra.mrb[38].mxu1 %vm195_vm1, %v190_v47 }
  0x64   :  { %2257 = vmatmul.mubr.msk.f32.gmra.mrb[8].mxu0 %vm195_vm1, %v2901_v35  ;;  %568 = vmatprep.mubr.f32.mxu1 %v2796_v7  ;;  %v191_v35 = vrot.slane %v3239_v49, 1 }
  0x65   :  { %755 = vmatprep.mubr.f32.mxu0 %v2796_v7 }
  0x66   :  { %v192_v52 = vsel %vm113_vm0, %v189_v28, %v191_v35 }
  0x67   :  { %2251 = vmatmul.mubr.msk.f32.gmra.mrb[40].mxu1 %vm195_vm1, %v192_v52 }
  0x68   :  { %2258 = vmatmul.mubr.msk.f32.gmra.mrb[10].mxu0 %vm195_vm1, %v2910_v38  ;;  %574 = vmatprep.mubr.f32.mxu1 %v2796_v7  ;;  %v193_v38 = vrot.slane %v55_v55, 1 }
  0x69   :  { %761 = vmatprep.mubr.f32.mxu0 %v2796_v7 }
  0x6a   :  { %v194_v57 = vsel %vm113_vm0, %v191_v35, %v193_v38 }
  0x6b   :  { %2252 = vmatmul.mubr.msk.f32.gmra.mrb[42].mxu1 %vm195_vm1, %v194_v57 }
  0x6c   :  { %2259 = vmatmul.mubr.msk.f32.gmra.mrb[12].mxu0 %vm195_vm1, %v2924_v42  ;;  %v1497_v42 = vld [vmem:[%s3967_s2 + $0x8] sm:$0xff] }
  0x6d   :  { %767 = vmatprep.mubr.f32.mxu0 %v2796_v7  ;;  %v2532_v0 = vpack.c.bf16 %v1497_v42, %v1496_v58 }
  0x6f   :  { %2533 = vmatprep.subr.bf16.mxu1 %v2532_v0 }
  0x70   :  { %2260 = vmatmul.mubr.msk.f32.gmra.mrb[14].mxu0 %vm195_vm1, %v2940_v48  ;;  %v2536_v48 = vpack.c.bf16 %v1499_v1, %v1498_v61  ;;  %2535 = vmatpush3.bf16.msra.mxu1 %v2532_v0 }
  0x71   :  { %773 = vmatprep.mubr.f32.mxu0 %v2796_v7 }
  0x72   :  { %2537 = vmatprep.subr.bf16.mxu1 %v2536_v48 }
  0x74   :  { %2261 = vmatmul.mubr.msk.f32.gmra.mrb[16].mxu0 %vm195_vm1, %v2960_v54  ;;  %2539 = vmatpush3.bf16.msra.mxu1 %v2536_v48  ;;  %v2544_v54 = vpack.c.bf16 %v1503_v14, %v1502_v10 }
  0x75   :  { %779 = vmatprep.mubr.f32.mxu0 %v2796_v7  ;;  %2541 = vmatprep.subr.bf16.mxu1 %v2540_v8 }
  0x78   :  { %2262 = vmatmul.mubr.msk.f32.gmra.mrb[18].mxu0 %vm195_vm1, %v2978_v60  ;;  %2543 = vmatpush3.bf16.msra.mxu1 %v2540_v8  ;;  %v2548_v60 = vpack.c.bf16 %v1505_v18, %v1504_v16 }
  0x79   :  { %785 = vmatprep.mubr.f32.mxu0 %v2796_v7  ;;  %2545 = vmatprep.subr.bf16.mxu1 %v2544_v54 }
  0x7c   :  { %2263 = vmatmul.mubr.msk.f32.gmra.mrb[20].mxu0 %vm195_vm1, %v2996_v2  ;;  %2547 = vmatpush3.bf16.msra.mxu1 %v2544_v54  ;;  %v2552_v2 = vpack.c.bf16 %v1507_v23, %v1506_v20 }
  0x7d   :  { %791 = vmatprep.mubr.f32.mxu0 %v2796_v7  ;;  %2549 = vmatprep.subr.bf16.mxu1 %v2548_v60 }
  0x80   :  { %2264 = vmatmul.mubr.msk.f32.gmra.mrb[22].mxu0 %vm195_vm1, %v3014_v9  ;;  %2551 = vmatpush3.bf16.msra.mxu1 %v2548_v60  ;;  %v1508_v9 = vld [vmem:[%s3967_s2 + $0x60] sm:$0xff] }
  0x81   :  { %797 = vmatprep.mubr.f32.mxu0 %v2796_v7  ;;  %2553 = vmatprep.subr.bf16.mxu1 %v2552_v2 }
  0x84   :  { %2265 = vmatmul.mubr.msk.f32.gmra.mrb[24].mxu0 %vm195_vm1, %v3032_v17  ;;  %2555 = vmatpush3.bf16.msra.mxu1 %v2552_v2 }
  0x85   :  { %803 = vmatprep.mubr.f32.mxu0 %v2796_v7 }
  0x88   :  { %2266 = vmatmul.mubr.msk.f32.gmra.mrb[26].mxu0 %vm195_vm1, %v3050_v24 }
  0x89   :  { %809 = vmatprep.mubr.f32.mxu0 %v2796_v7 }
  0x8c   :  { %2267 = vmatmul.mubr.msk.f32.gmra.mrb[28].mxu0 %vm195_vm1, %v3068_v31 }
  0x8d   :  { %815 = vmatprep.mubr.f32.mxu0 %v2796_v7 }
  0x90   :  { %2268 = vmatmul.mubr.msk.f32.gmra.mrb[30].mxu0 %vm195_vm1, %v3086_v39 }
  0x91   :  { %821 = vmatprep.mubr.f32.mxu0 %v2796_v7 }
  0x94   :  { %2269 = vmatmul.mubr.msk.f32.gmra.mrb[32].mxu0 %vm195_vm1, %v3104_v51 }
  0x95   :  { %827 = vmatprep.mubr.f32.mxu0 %v2796_v7 }
  0x98   :  { %2270 = vmatmul.mubr.msk.f32.gmra.mrb[34].mxu0 %vm195_vm1, %v3122_v59 }
  0x99   :  { %833 = vmatprep.mubr.f32.mxu0 %v2796_v7 }
  0x9c   :  { %2271 = vmatmul.mubr.msk.f32.gmra.mrb[36].mxu0 %vm195_vm1, %v2919_v41  ;;  %v1509_v41 = vld [vmem:[%s3967_s2 + $0x68] sm:$0xff] }
  0x9d   :  { %839 = vmatprep.mubr.f32.mxu0 %v2796_v7  ;;  %v2556_v17 = vpack.c.bf16 %v1509_v41, %v1508_v9 }
  0x9f   :  { %2557 = vmatprep.subr.bf16.mxu1 %v2556_v17 }
  0xa0   :  { %2272 = vmatmul.mubr.msk.f32.gmra.mrb[38].mxu0 %vm195_vm1, %v2929_v43  ;;  %2559 = vmatpush3.bf16.msra.mxu1 %v2556_v17  ;;  %v1510_v43 = vld [vmem:[%s3967_s2 + $0x70] sm:$0xff] }
  0xa1   :  { %845 = vmatprep.mubr.f32.mxu0 %v2796_v7 }
  0xa4   :  { %2273 = vmatmul.mubr.msk.f32.gmra.mrb[40].mxu0 %vm195_vm1, %v2949_v50  ;;  %v1511_v50 = vld [vmem:[%s3967_s2 + $0x78] sm:$0xff]  ;;  %s2797_s2 = smov [#allocation3]  }
  0xa5   :  { %851 = vmatprep.mubr.f32.mxu0 %v2796_v7  ;;  %v2560_v24 = vpack.c.bf16 %v1511_v50, %v1510_v43  ;;  %s2202_s17 = sshll.u32 %s2797_s2, 4  ;;  %s2203_s17 = int_to_ptr.vmem [resolvable:$true] %s2202_s17 }
  0xa6   :  { %s2772_s18 = scalar_lea.vmem %s2203_s17, 8960  ;;  %p2777_p1 = scmp.lt.s32.totalorder %s2203_s17, %s2203_s17 }
  0xa7   :  { %2561 = vmatprep.subr.bf16.mxu1 %v2560_v24  ;;  %p2773_p0 = scmp.ne.s32.totalorder %s2203_s17, %s2772_s18  ;;  %p2778_p2 = scmp.lt.s32.totalorder %s2772_s18, %s2772_s18 }
  0xa8   :  { %2274 = vmatmul.mubr.msk.f32.gmra.mrb[42].mxu0 %vm195_vm1, %v2967_v56  ;;  %2563 = vmatpush3.bf16.msra.mxu1 %v2560_v24 }
  0xa9   :  { %857 = vmatprep.mubr.f32.mxu0 %v2796_v7  ;;  %p2779_p3 = por %p2778_p2, %p2777_p1 }
  0xab   :  { %p2780_p4 = pnand %p2779_p3, %p2773_p0 }
  0xac   :  { %2275 = vmatmul.mubr.msk.f32.gmra.mrb[44].mxu0 %vm195_vm1, %v2985_v62 }
  0xad   :  { %863 = vmatprep.mubr.f32.mxu0 %v2796_v7 }
  0xb0   :  { %2276 = vmatmul.mubr.msk.f32.gmra.mrb[46].mxu0 %vm195_vm1, %v3003_v4 }
  0xb1   :  { %869 = vmatprep.mubr.f32.mxu0 %v2796_v7 }
  0xb4   :  { %2277 = vmatmul.mubr.msk.f32.gmra.mrb[48].mxu0 %vm195_vm1, %v3021_v11 }
  0xb5   :  { %875 = vmatprep.mubr.f32.mxu0 %v2796_v7 }
  0xb8   :  { %2278 = vmatmul.mubr.msk.f32.gmra.mrb[50].mxu0 %vm195_vm1, %v3039_v19 }
  0xb9   :  { %881 = vmatprep.mubr.f32.mxu0 %v2796_v7 }
  0xbc   :  { %2279 = vmatmul.mubr.msk.f32.gmra.mrb[52].mxu0 %vm195_vm1, %v3057_v26 }
  0xbd   :  { %887 = vmatprep.mubr.f32.mxu0 %v2796_v7 }
  0xc0   :  { %2280 = vmatmul.mubr.msk.f32.gmra.mrb[54].mxu0 %vm195_vm1, %v3075_v33 }
  0xc1   :  { %893 = vmatprep.mubr.f32.mxu0 %v2796_v7 }
  0xc4   :  { %2281 = vmatmul.mubr.msk.f32.gmra.mrb[56].mxu0 %vm195_vm1, %v3093_v45 }
  0xc5   :  { %899 = vmatprep.mubr.f32.mxu0 %v2796_v7 }
  0xc8   :  { %2282 = vmatmul.mubr.msk.f32.gmra.mrb[58].mxu0 %vm195_vm1, %v3111_v53 }
  0xc9   :  { %905 = vmatprep.mubr.f32.mxu0 %v2796_v7 }
  0xcc   :  { %2283 = vmatmul.mubr.msk.f32.gmra.mrb[60].mxu0 %vm195_vm1, %v3129_v63 }
  0xcd   :  { %911 = vmatprep.mubr.f32.mxu0 %v2796_v7 }
  0xd0   :  { %2284 = vmatmul.mubr.msk.f32.gmra.mrb[62].mxu0 %vm195_vm1, %v3142_v6 }
  0xd1   :  { %917 = vmatprep.mubr.f32.mxu0 %v2796_v7 }
  0xd4   :  { %2285 = vmatmul.mubr.msk.f32.gmra.mrb[64].mxu0 %vm195_vm1, %v3154_v15 }
  0xd5   :  { %923 = vmatprep.mubr.f32.mxu0 %v2796_v7 }
  0xd8   :  { %2286 = vmatmul.mubr.msk.f32.gmra.mrb[66].mxu0 %vm195_vm1, %v3168_v21 }
  0xd9   :  { %929 = vmatprep.mubr.f32.mxu0 %v2796_v7 }
  0xdc   :  { %2287 = vmatmul.mubr.msk.f32.gmra.mrb[68].mxu0 %vm195_vm1, %v3179_v44 }
  0xdd   :  { %935 = vmatprep.mubr.f32.mxu0 %v2796_v7 }
  0xe0   :  { %2288 = vmatmul.mubr.msk.f32.gmra.mrb[70].mxu0 %vm195_vm1, %v3191_v30 }
  0xe1   :  { %941 = vmatprep.mubr.f32.mxu0 %v2796_v7 }
  0xe4   :  { %2289 = vmatmul.mubr.msk.f32.gmra.mrb[72].mxu0 %vm195_vm1, %v3203_v34 }
  0xe5   :  { %947 = vmatprep.mubr.f32.mxu0 %v2796_v7 }
  0xe6   :  { %v3403_v56 = vpop.f32.mrb[0].mxu1 }
  0xe7   :  { %v3405_v62 = vpop.f32.mrb[1].mxu1 }
  0xe8   :  { %2290 = vmatmul.mubr.msk.f32.gmra.mrb[74].mxu0 %vm195_vm1, %v3215_v37 }
  0xe9   :  { %953 = vmatprep.mubr.f32.mxu0 %v2796_v7 }
  0xea   :  { %v3407_v4 = vpop.f32.mrb[2].mxu1 }
  0xeb   :  { %v3409_v11 = vpop.f32.mrb[3].mxu1 }
  0xec   :  { %2291 = vmatmul.mubr.msk.f32.gmra.mrb[76].mxu0 %vm195_vm1, %v3227_v46 }
  0xed   :  { %959 = vmatprep.mubr.f32.mxu0 %v2796_v7 }
  0xee   :  { %v3411_v19 = vpop.f32.mrb[4].mxu1 }
  0xef   :  { %v3413_v26 = vpop.f32.mrb[5].mxu1 }
  0xf0   :  { %2292 = vmatmul.mubr.msk.f32.gmra.mrb[78].mxu0 %vm195_vm1, %v3239_v49 }
  0xf2   :  { %v3415_v31 = vpop.f32.mrb[6].mxu1 }
  0xf3   :  { %v3417_v33 = vpop.f32.mrb[7].mxu1 }
  0xf6   :  { %v3419_v7 = vpop.f32.mrb[8].mxu1 }
  0xf7   :  { %v3421_v39 = vpop.f32.mrb[9].mxu1 }
  0xfa   :  { %v3423_v45 = vpop.f32.mrb[10].mxu1 }
  0xfb   :  { %v3425_v51 = vpop.f32.mrb[11].mxu1 }
  0xfe   :  { %v3427_v53 = vpop.f32.mrb[12].mxu1 }
  0xff   :  { %v3429_v59 = vpop.f32.mrb[13].mxu1 }
 0x102   :  { %v3431_v63 = vpop.f32.mrb[14].mxu1 }
 0x103   :  { %v3433_v6 = vpop.f32.mrb[15].mxu1 }
 0x106   :  { %v3435_v15 = vpop.f32.mrb[16].mxu1 }
 0x107   :  { %v3437_v21 = vpop.f32.mrb[17].mxu1 }
 0x10a   :  { %v3439_v25 = vpop.f32.mrb[18].mxu1 }
 0x10b   :  { %v3441_v44 = vpop.f32.mrb[19].mxu1 }
 0x10e   :  { %v3443_v27 = vpop.f32.mrb[20].mxu1 }
 0x10f   :  { %v3445_v29 = vpop.f32.mrb[21].mxu1 }
 0x112   :  { %v3447_v30 = vpop.f32.mrb[22].mxu1 }
 0x113   :  { %v3449_v12 = vpop.f32.mrb[23].mxu1 }
 0x116   :  { %v3451_v32 = vpop.f32.mrb[24].mxu1 }
 0x117   :  { %3971 = vst [vmem:[#allocation6_spill] sm:$0xff] %v3451_v32  ;;  %v3453_v34 = vpop.f32.mrb[25].mxu1 }
 0x118   :  { %3972 = vst [vmem:[#allocation7_spill] sm:$0xff] %v3453_v34 }
 0x11a   :  { %v3455_v13 = vpop.f32.mrb[26].mxu1 }
 0x11b   :  { %3973 = vst [vmem:[#allocation8_spill] sm:$0xff] %v3455_v13  ;;  %v3457_v36 = vpop.f32.mrb[27].mxu1 }
 0x11c   :  { %3974 = vst [vmem:[#allocation9_spill] sm:$0xff] %v3457_v36 }
 0x11e   :  { %v3467_v28 = vpop.f32.mrb[28].mxu1 }
 0x11f   :  { %3975 = vst [vmem:[#allocation10_spill] sm:$0xff] %v3467_v28  ;;  %v3469_v47 = vpop.f32.mrb[29].mxu1 }
 0x120   :  { %3976 = vst [vmem:[#allocation11_spill] sm:$0xff] %v3469_v47 }
 0x122   :  { %v3479_v57 = vpop.f32.mrb[30].mxu1 }
 0x123   :  { %3977 = vst [vmem:[#allocation12_spill] sm:$0xff] %v3479_v57  ;;  %v3481_v58 = vpop.f32.mrb[31].mxu1 }
 0x124   :  { %3978 = vst [vmem:[#allocation13_spill] sm:$0xff] %v3481_v58 }
 0x127   :  { %v3459_v37 = vpop.f32.mrb[0].mxu0 }
 0x128   :  { %v966_v22 = vmul.f32 %v3459_v37, %v3459_v37  ;;  %v3463_v40 = vpop.f32.mrb[1].mxu0 }
 0x129   :  { %v986_v46 = vmul.f32 %v3463_v40, %v3463_v40 }
 0x12a   :  { %v3491_v3 = vpop.f32.mrb[32].mxu1 }
 0x12b   :  { %v3471_v49 = vpop.f32.mrb[2].mxu0  ;;  %v1006_v35 = vadd.f32 %v986_v46, %v966_v22  ;;  %3979 = vst [vmem:[#allocation14_spill] sm:$0xff] %v3491_v3  ;;  %v3493_v5 = vpop.f32.mrb[33].mxu1 }
 0x12c   :  { %v967_v52 = vmul.f32 %v3471_v49, %v3471_v49  ;;  %v3475_v55 = vpop.f32.mrb[3].mxu0  ;;  %3980 = vst [vmem:[#allocation15_spill] sm:$0xff] %v3493_v5 }
 0x12d   :  { %v987_v38 = vmul.f32 %v3475_v55, %v3475_v55  ;;  %2411 = vmatprep.mubr.f32.mxu1 %v1006_v35 }
 0x12e   :  { %v3503_v18 = vpop.f32.mrb[34].mxu1 }
 0x12f   :  { %v1007_v42 = vadd.f32 %v987_v38, %v967_v52  ;;  %v3483_v61 = vpop.f32.mrb[4].mxu0  ;;  %3981 = vst [vmem:[#allocation16_spill] sm:$0xff] %v3503_v18  ;;  %v3505_v60 = vpop.f32.mrb[35].mxu1 }
 0x130   :  { %v968_v0 = vmul.f32 %v3483_v61, %v3483_v61  ;;  %v3487_v1 = vpop.f32.mrb[5].mxu0  ;;  %3982 = vst [vmem:[#allocation17_spill] sm:$0xff] %v3505_v60 }
 0x131   :  { %v988_v48 = vmul.f32 %v3487_v1, %v3487_v1  ;;  %2412 = vmatmul.mubr.f32.vlgmr.msra.gmra.mrb[44].mxu1 %v1007_v42 }
 0x132   :  { %v3515_v17 = vpop.f32.mrb[36].mxu1 }
 0x133   :  { %v3495_v8 = vpop.f32.mrb[6].mxu0  ;;  %v1008_v10 = vadd.f32 %v988_v48, %v968_v0  ;;  %3983 = vst [vmem:[#allocation18_spill] sm:$0xff] %v3515_v17  ;;  %v3517_v43 = vpop.f32.mrb[37].mxu1 }
 0x134   :  { %v969_v14 = vmul.f32 %v3495_v8, %v3495_v8  ;;  %v3499_v54 = vpop.f32.mrb[7].mxu0  ;;  %3984 = vst [vmem:[#allocation19_spill] sm:$0xff] %v3517_v43 }
 0x135   :  { %v989_v16 = vmul.f32 %v3499_v54, %v3499_v54  ;;  %2414 = vmatprep.mubr.f32.mxu1 %v1008_v10 }
 0x136   :  { %v3521_v42 = vpop.f32.mrb[38].mxu1 }
 0x137   :  { %v3507_v20 = vpop.f32.mrb[8].mxu0  ;;  %v1009_v23 = vadd.f32 %v989_v16, %v969_v14  ;;  %3985 = vst [vmem:[#allocation20_spill] sm:$0xff] %v3521_v42  ;;  %v3523_v0 = vpop.f32.mrb[39].mxu1 }
 0x138   :  { %v970_v2 = vmul.f32 %v3507_v20, %v3507_v20  ;;  %v3511_v9 = vpop.f32.mrb[9].mxu0  ;;  %3986 = vst [vmem:[#allocation21_spill] sm:$0xff] %v3523_v0 }
 0x139   :  { %v990_v41 = vmul.f32 %v3511_v9, %v3511_v9  ;;  %2415 = vmatmul.mubr.f32.gmra.mrb[46].mxu1 %v1009_v23 }
 0x13a   :  { %v3529_v43 = vpop.f32.mrb[40].mxu1 }
 0x13b   :  { %v757_v50 = vpop.f32.mrb[10].mxu0  ;;  %v1010_v24 = vadd.f32 %v990_v41, %v970_v2  ;;  %3987 = vst [vmem:[#allocation22_spill] sm:$0xff] %v3529_v43 }
 0x13c   :  { %v971_v22 = vmul.f32 %v757_v50, %v757_v50  ;;  %v1046_v46 = vmul.f32 %v757_v50, %v3459_v37  ;;  %v759_v35 = vpop.f32.mrb[11].mxu0 }
 0x13d   :  { %v991_v52 = vmul.f32 %v759_v35, %v759_v35  ;;  %v1051_v38 = vmul.f32 %v759_v35, %v3463_v40  ;;  %2417 = vmatprep.mubr.f32.mxu1 %v1010_v24  ;;  %v3531_v35 = vpop.f32.mrb[41].mxu1 }
 0x13e   :  { %3988 = vst [vmem:[#allocation23_spill] sm:$0xff] %v3531_v35  ;;  %v3537_v17 = vpop.f32.mrb[42].mxu1 }
 0x13f   :  { %v1011_v48 = vadd.f32 %v991_v52, %v971_v22  ;;  %v3525_v10 = vadd.f32 %v1051_v38, %v1046_v46  ;;  %v763_v14 = vpop.f32.mrb[12].mxu0  ;;  %3989 = vst [vmem:[#allocation24_spill] sm:$0xff] %v3537_v17 }
 0x140   :  { %v972_v16 = vmul.f32 %v763_v14, %v763_v14  ;;  %v1047_v23 = vmul.f32 %v763_v14, %v3471_v49  ;;  %v765_v2 = vpop.f32.mrb[13].mxu0 }
 0x141   :  { %v992_v41 = vmul.f32 %v765_v2, %v765_v2  ;;  %v1052_v50 = vmul.f32 %v765_v2, %v3475_v55  ;;  %2418 = vmatmul.mubr.f32.gmra.mrb[48].mxu1 %v1011_v48  ;;  %v3539_v2 = vpop.f32.mrb[43].mxu1 }
 0x142   :  { %3990 = vst [vmem:[#allocation25_spill] sm:$0xff] %v3539_v2 }
 0x143   :  { %v1012_v24 = vadd.f32 %v992_v41, %v972_v16  ;;  %v3533_v42 = vadd.f32 %v1052_v50, %v1047_v23  ;;  %v769_v0 = vpop.f32.mrb[14].mxu0 }
 0x144   :  { %v973_v22 = vmul.f32 %v769_v0, %v769_v0  ;;  %v1048_v46 = vmul.f32 %v769_v0, %v3483_v61  ;;  %v771_v52 = vpop.f32.mrb[15].mxu0 }
 0x145   :  { %v993_v38 = vmul.f32 %v771_v52, %v771_v52  ;;  %v1053_v14 = vmul.f32 %v771_v52, %v3487_v1  ;;  %2420 = vmatprep.mubr.f32.mxu1 %v1012_v24 }
 0x147   :  { %v1013_v48 = vadd.f32 %v993_v38, %v973_v22  ;;  %v3541_v43 = vadd.f32 %v1053_v14, %v1048_v46  ;;  %v775_v35 = vpop.f32.mrb[16].mxu0 }
 0x148   :  { %v974_v16 = vmul.f32 %v775_v35, %v775_v35  ;;  %v1049_v23 = vmul.f32 %v775_v35, %v3495_v8  ;;  %v777_v41 = vpop.f32.mrb[17].mxu0 }
 0x149   :  { %v994_v50 = vmul.f32 %v777_v41, %v777_v41  ;;  %v1054_v0 = vmul.f32 %v777_v41, %v3499_v54  ;;  %2421 = vmatmul.mubr.f32.gmra.mrb[50].mxu1 %v1013_v48 }
 0x14b   :  { %v1014_v60 = vadd.f32 %v994_v50, %v974_v16  ;;  %v3545_v18 = vadd.f32 %v1054_v0, %v1049_v23  ;;  %v781_v24 = vpop.f32.mrb[18].mxu0 }
 0x14c   :  { %v975_v52 = vmul.f32 %v781_v24, %v781_v24  ;;  %v1050_v17 = vmul.f32 %v781_v24, %v3507_v20  ;;  %v783_v2 = vpop.f32.mrb[19].mxu0 }
 0x14d   :  { %v995_v22 = vmul.f32 %v783_v2, %v783_v2  ;;  %v1055_v46 = vmul.f32 %v783_v2, %v3511_v9  ;;  %2423 = vmatprep.mubr.f32.mxu1 %v1014_v60 }
 0x14f   :  { %v1015_v38 = vadd.f32 %v995_v22, %v975_v52  ;;  %v3549_v14 = vadd.f32 %v1055_v46, %v1050_v17  ;;  %v787_v35 = vpop.f32.mrb[20].mxu0  ;;  %v1091_v17 = vmul.f32 %v3525_v10, %v3525_v10 }
 0x150   :  { %v976_v5 = vmul.f32 %v787_v35, %v787_v35  ;;  %v1061_v41 = vmul.f32 %v787_v35, %v3459_v37  ;;  %v789_v48 = vpop.f32.mrb[21].mxu0 }
 0x151   :  { %3991 = vst [vmem:[#allocation26_spill] sm:$0xff] %v3549_v14  ;;  %v996_v16 = vmul.f32 %v789_v48, %v789_v48  ;;  %v1066_v23 = vmul.f32 %v789_v48, %v3463_v40  ;;  %2424 = vmatmul.mubr.f32.gmra.mrb[52].mxu1 %v1015_v38 }
 0x153   :  { %v1016_v50 = vadd.f32 %v996_v16, %v976_v5  ;;  %v3553_v0 = vadd.f32 %v1066_v23, %v1061_v41  ;;  %v793_v24 = vpop.f32.mrb[22].mxu0 }
 0x154   :  { %v977_v3 = vmul.f32 %v793_v24, %v793_v24  ;;  %v1062_v2 = vmul.f32 %v793_v24, %v3471_v49  ;;  %v795_v60 = vpop.f32.mrb[23].mxu0  ;;  %v1092_v24 = vmul.f32 %v3533_v42, %v3533_v42 }
 0x155   :  { %v1096_v52 = vmul.f32 %v3553_v0, %v3553_v0  ;;  %v997_v22 = vmul.f32 %v795_v60, %v795_v60  ;;  %v1067_v46 = vmul.f32 %v795_v60, %v3475_v55  ;;  %2426 = vmatprep.mubr.f32.mxu1 %v1016_v50 }
 0x157   :  { %v1101_v35 = vadd.f32 %v1096_v52, %v1091_v17  ;;  %v1017_v38 = vadd.f32 %v997_v22, %v977_v3  ;;  %v3561_v5 = vadd.f32 %v1067_v46, %v1062_v2  ;;  %v799_v41 = vpop.f32.mrb[24].mxu0  ;;  %v1093_v46 = vmul.f32 %v3541_v43, %v3541_v43 }
 0x158   :  { %v978_v48 = vmul.f32 %v799_v41, %v799_v41  ;;  %v1063_v16 = vmul.f32 %v799_v41, %v3483_v61  ;;  %v801_v23 = vpop.f32.mrb[25].mxu0 }
 0x159   :  { %v1097_v58 = vmul.f32 %v3561_v5, %v3561_v5  ;;  %v998_v57 = vmul.f32 %v801_v23, %v801_v23  ;;  %v1068_v47 = vmul.f32 %v801_v23, %v3487_v1  ;;  %2427 = vmatmul.mubr.f32.gmra.mrb[54].mxu1 %v1017_v38 }
 0x15b   :  { %v1102_v50 = vadd.f32 %v1097_v58, %v1092_v24  ;;  %v1018_v60 = vadd.f32 %v998_v57, %v978_v48  ;;  %v3569_v3 = vadd.f32 %v1068_v47, %v1063_v16  ;;  %v805_v2 = vpop.f32.mrb[26].mxu0  ;;  %v1094_v24 = vmul.f32 %v3545_v18, %v3545_v18 }
 0x15c   :  { %v979_v17 = vmul.f32 %v805_v2, %v805_v2  ;;  %v1064_v52 = vmul.f32 %v805_v2, %v3495_v8  ;;  %v807_v22 = vpop.f32.mrb[27].mxu0 }
 0x15d   :  { %v1098_v41 = vmul.f32 %v3569_v3, %v3569_v3  ;;  %v999_v28 = vmul.f32 %v807_v22, %v807_v22  ;;  %v1069_v36 = vmul.f32 %v807_v22, %v3499_v54  ;;  %2429 = vmatprep.mubr.f32.mxu1 %v1018_v60 }
 0x15f   :  { %v3577_v38 = vadd.f32 %v1098_v41, %v1093_v46  ;;  %v1019_v57 = vadd.f32 %v999_v28, %v979_v17  ;;  %v3579_v47 = vadd.f32 %v1069_v36, %v1064_v52  ;;  %v811_v58 = vpop.f32.mrb[28].mxu0 }
 0x160   :  { %v980_v48 = vmul.f32 %v811_v58, %v811_v58  ;;  %v1065_v16 = vmul.f32 %v811_v58, %v3507_v20  ;;  %v813_v23 = vpop.f32.mrb[29].mxu0  ;;  %v1095_v58 = vmul.f32 %v3549_v14, %v3549_v14 }
 0x161   :  { %v1099_v2 = vmul.f32 %v3579_v47, %v3579_v47  ;;  %v1000_v13 = vmul.f32 %v813_v23, %v813_v23  ;;  %v1070_v22 = vmul.f32 %v813_v23, %v3511_v9  ;;  %2430 = vmatmul.mubr.f32.gmra.mrb[56].mxu1 %v1019_v57 }
 0x163   :  { %v3587_v60 = vadd.f32 %v1099_v2, %v1094_v24  ;;  %v1020_v28 = vadd.f32 %v1000_v13, %v980_v48  ;;  %v3589_v36 = vadd.f32 %v1070_v22, %v1065_v16  ;;  %v817_v17 = vpop.f32.mrb[30].mxu0 }
 0x164   :  { %v981_v52 = vmul.f32 %v817_v17, %v817_v17  ;;  %v1076_v46 = vmul.f32 %v817_v17, %v3459_v37  ;;  %v819_v41 = vpop.f32.mrb[31].mxu0 }
 0x165   :  { %3992 = vst [vmem:[#allocation27_spill] sm:$0xff] %v3589_v36  ;;  %v1100_v34 = vmul.f32 %v3589_v36, %v3589_v36  ;;  %v1001_v32 = vmul.f32 %v819_v41, %v819_v41  ;;  %v1081_v23 = vmul.f32 %v819_v41, %v3463_v40  ;;  %2432 = vmatprep.mubr.f32.mxu1 %v1020_v28 }
 0x167   :  { %v3597_v57 = vadd.f32 %v1100_v34, %v1095_v58  ;;  %v1021_v13 = vadd.f32 %v1001_v32, %v981_v52  ;;  %v3599_v48 = vadd.f32 %v1081_v23, %v1076_v46  ;;  %v823_v16 = vpop.f32.mrb[32].mxu0 }
 0x168   :  { %v982_v24 = vmul.f32 %v823_v16, %v823_v16  ;;  %v1077_v37 = vmul.f32 %v823_v16, %v3471_v49  ;;  %v825_v2 = vpop.f32.mrb[33].mxu0 }
 0x169   :  { %v1106_v22 = vmul.f32 %v3599_v48, %v3599_v48  ;;  %v1002_v17 = vmul.f32 %v825_v2, %v825_v2  ;;  %v1082_v36 = vmul.f32 %v825_v2, %v3475_v55  ;;  %2433 = vmatmul.mubr.f32.gmra.mrb[58].mxu1 %v1021_v13 }
 0x16b   :  { %v1111_v14 = vadd.f32 %v1106_v22, %v1101_v35  ;;  %v1022_v40 = vadd.f32 %v1002_v17, %v982_v24  ;;  %v3605_v28 = vadd.f32 %v1082_v36, %v1077_v37  ;;  %v829_v34 = vpop.f32.mrb[34].mxu0 }
 0x16c   :  { %v983_v32 = vmul.f32 %v829_v34, %v829_v34  ;;  %v1078_v52 = vmul.f32 %v829_v34, %v3483_v61  ;;  %v831_v46 = vpop.f32.mrb[35].mxu0 }
 0x16d   :  { %2652 = vrsqrt.f32 %v1111_v14  ;;  %2435 = vmatprep.mubr.f32.mxu1 %v1022_v40  ;;  %v1107_v49 = vmul.f32 %v3605_v28, %v3605_v28  ;;  %v1003_v41 = vmul.f32 %v831_v46, %v831_v46  ;;  %v1083_v58 = vmul.f32 %v831_v46, %v3487_v1 }
 0x16e   :  { %vm1118_vm2 = vcmp.eq.f32.partialorder %v1111_v14, inf  ;;  %vm1120_vm3 = vcmp.eq.f32.partialorder %v1111_v14, 0.0 }
 0x16f   :  { %v835_v23 = vpop.f32.mrb[36].mxu0  ;;  %v3611_v55 = vadd.f32 %v1107_v49, %v1102_v50  ;;  %v1023_v35 = vadd.f32 %v1003_v41, %v983_v32  ;;  %v3613_v13 = vadd.f32 %v1083_v58, %v1078_v52  ;;  %v1121_v58 = vand.u32 2147483648, %v1111_v14 }
 0x170   :  { %v836_v36 = vadd.f32 %v835_v23, %v3403_v56  ;;  %v837_v16 = vpop.f32.mrb[37].mxu0 }
 0x171   :  { %v838_v61 = vadd.f32 %v837_v16, %v3405_v62  ;;  %2654 = vrsqrt.f32 %v3611_v55  ;;  %2436 = vmatmul.mubr.f32.gmra.mrb[60].mxu1 %v1023_v35  ;;  %v1108_v24 = vmul.f32 %v3613_v13, %v3613_v13  ;;  %vm1125_vm4 = vcmp.eq.f32.partialorder %v3611_v55, inf }
 0x172   :  { %v984_v37 = vmul.f32 %v836_v36, %v836_v36  ;;  %v1079_v1 = vmul.f32 %v836_v36, %v3495_v8  ;;  %vm1127_vm5 = vcmp.eq.f32.partialorder %v3611_v55, 0.0 }
 0x173   :  { %v1004_v2 = vmul.f32 %v838_v61, %v838_v61  ;;  %v841_v50 = vpop.f32.mrb[38].mxu0  ;;  %v1084_v22 = vmul.f32 %v838_v61, %v3499_v54  ;;  %v3624_v56 = vadd.f32 %v1108_v24, %v3577_v38 }
 0x174   :  { %v842_v17 = vadd.f32 %v841_v50, %v3407_v4  ;;  %v843_v40 = vpop.f32.mrb[39].mxu0 }
 0x175   :  { %v844_v62 = vadd.f32 %v843_v40, %v3409_v11  ;;  %v1024_v34 = vadd.f32 %v1004_v2, %v984_v37  ;;  %v3627_v32 = vadd.f32 %v1084_v22, %v1079_v1  ;;  %2656 = vrsqrt.f32 %v3624_v56 }
 0x176   :  { %v985_v52 = vmul.f32 %v842_v17, %v842_v17  ;;  %v1080_v46 = vmul.f32 %v842_v17, %v3507_v20  ;;  %v1128_v22 = vand.u32 2147483648, %v3611_v55  ;;  %vm1132_vm6 = vcmp.eq.f32.partialorder %v3624_v56, inf }
 0x177   :  { %v2653_v49 = vpop.eup %2652  ;;  %v847_v8 = vpop.f32.mrb[40].mxu0  ;;  %2438 = vmatprep.mubr.f32.mxu1 %v1024_v34  ;;  %v1109_v4 = vmul.f32 %v3627_v32, %v3627_v32  ;;  %v1005_v38 = vmul.f32 %v844_v62, %v844_v62  ;;  %v1085_v41 = vmul.f32 %v844_v62, %v3511_v9  ;;  %vm1134_vm7 = vcmp.eq.f32.partialorder %v3624_v56, 0.0 }
 0x178   :  { %v1117_v54 = vmul.f32 %v2653_v49, %v1111_v14  ;;  %v849_v11 = vpop.f32.mrb[41].mxu0  ;;  %v3635_v23 = vadd.f32 %v847_v8, %v3411_v19 }
 0x179   :  { %v3638_v20 = vadd.f32 %v849_v11, %v3413_v26  ;;  %v3641_v36 = vadd.f32 %v1109_v4, %v3587_v60  ;;  %v3643_v16 = vadd.f32 %v1085_v41, %v1080_v46  ;;  %v1025_v61 = vadd.f32 %v1005_v38, %v985_v52 }
 0x17a   :  { %v1119_v35 = vsel %vm1118_vm2, %v1111_v14, %v1117_v54  ;;  %v1196_v9 = vmul.f32 %v3635_v23, %v3635_v23 }
 0x17b   :  { %v1122_v24 = vsel %vm1120_vm3, %v1121_v58, %v1119_v35  ;;  %v853_v37 = vpop.f32.mrb[42].mxu0  ;;  %v1216_v1 = vmul.f32 %v3638_v20, %v3638_v20  ;;  %v2655_v19 = vpop.eup %2654  ;;  %2658 = vrsqrt.f32 %v3641_v36  ;;  %2439 = vmatmul.mubr.f32.gmra.mrb[62].mxu1 %v1025_v61  ;;  %v1110_v60 = vmul.f32 %v3643_v16, %v3643_v16 }
 0x17c   :  { %v1151_v2 = vadd.f32 1.1920929e-07, %v1122_v24  ;;  %v855_v26 = vpop.f32.mrb[43].mxu0  ;;  %v1124_v14 = vmul.f32 %v2655_v19, %v3611_v55  ;;  %v3655_v50 = vadd.f32 %v853_v37, %v3415_v31  ;;  %vm1139_vm8 = vcmp.eq.f32.partialorder %v3641_v36, inf }
 0x17d   :  { %v3659_v17 = vadd.f32 %v855_v26, %v3417_v33  ;;  %v3661_v40 = vadd.f32 %v1216_v1, %v1196_v9  ;;  %v3666_v34 = vadd.f32 %v1110_v60, %v3597_v57  ;;  %vm1141_vm9 = vcmp.eq.f32.partialorder %v3641_v36, 0.0 }
 0x17e   :  { %2660 = vrcp.f32 %v1151_v2  ;;  %v1126_v62 = vsel %vm1125_vm4, %v3611_v55, %v1124_v14  ;;  %v1197_v31 = vmul.f32 %v3655_v50, %v3655_v50 }
 0x17f   :  { %v859_v52 = vpop.f32.mrb[44].mxu0  ;;  %v1129_v46 = vsel %vm1127_vm5, %v1128_v22, %v1126_v62  ;;  %v1217_v8 = vmul.f32 %v3659_v17, %v3659_v17  ;;  %v2657_v54 = vpop.eup %2656  ;;  %2662 = vrsqrt.f32 %v3666_v34  ;;  %vm1146_vm10 = vcmp.eq.f32.partialorder %v3666_v34, inf }
 0x180   :  { %v3671_v49 = vadd.f32 %v859_v52, %v3419_v7  ;;  %v861_v33 = vpop.f32.mrb[45].mxu0  ;;  %v1152_v4 = vadd.f32 1.1920929e-07, %v1129_v46  ;;  %v1131_v55 = vmul.f32 %v2657_v54, %v3624_v56  ;;  %v1135_v7 = vand.u32 2147483648, %v3624_v56 }
 0x181   :  { %v3678_v57 = vadd.f32 %v861_v33, %v3421_v39  ;;  %v3680_v38 = vadd.f32 %v1217_v8, %v1197_v31  ;;  %vm1148_vm11 = vcmp.eq.f32.partialorder %v3666_v34, 0.0 }
 0x182   :  { %2664 = vrcp.f32 %v1152_v4  ;;  %v1198_v11 = vmul.f32 %v3671_v49, %v3671_v49  ;;  %v1133_v58 = vsel %vm1132_vm6, %v3624_v56, %v1131_v55 }
 0x183   :  { %v865_v41 = vpop.f32.mrb[46].mxu0  ;;  %v1218_v61 = vmul.f32 %v3678_v57, %v3678_v57  ;;  %v1136_v24 = vsel %vm1134_vm7, %v1135_v7, %v1133_v58 }
 0x184   :  { %v3689_v35 = vadd.f32 %v865_v41, %v3423_v45  ;;  %v867_v39 = vpop.f32.mrb[47].mxu0  ;;  %v1153_v1 = vadd.f32 1.1920929e-07, %v1136_v24  ;;  %v1149_v41 = vand.u32 2147483648, %v3666_v34 }
 0x185   :  { %v3694_v37 = vadd.f32 %v867_v39, %v3425_v51  ;;  %v2659_v9 = vpop.eup %2658  ;;  %v3696_v19 = vadd.f32 %v1218_v61, %v1198_v11  ;;  %v1142_v51 = vand.u32 2147483648, %v3641_v36 }
 0x186   :  { %v1199_v2 = vmul.f32 %v3689_v35, %v3689_v35  ;;  %v1138_v56 = vmul.f32 %v2659_v9, %v3641_v36  ;;  %2666 = vrcp.f32 %v1153_v1 }
 0x187   :  { %v871_v45 = vpop.f32.mrb[48].mxu0  ;;  %v1219_v26 = vmul.f32 %v3694_v37, %v3694_v37 }
 0x188   :  { %v2661_v14 = vpop.eup %2660  ;;  %v3707_v60 = vadd.f32 %v871_v45, %v3427_v53  ;;  %v873_v22 = vpop.f32.mrb[49].mxu0  ;;  %v1140_v62 = vsel %vm1139_vm8, %v3641_v36, %v1138_v56 }
 0x189   :  { %v3711_v52 = vadd.f32 %v873_v22, %v3429_v59  ;;  %v1166_v31 = vmul.f32 %v2661_v14, %v3525_v10  ;;  %v3715_v46 = vmul.f32 %v2661_v14, %v3553_v0  ;;  %v1143_v33 = vsel %vm1141_vm9, %v1142_v51, %v1140_v62  ;;  %v2663_v4 = vpop.eup %2662 }
 0x18a   :  { %v3718_v8 = vmul.f32 %v2661_v14, %v3599_v48  ;;  %v3720_v54 = vadd.f32 %v1219_v26, %v1199_v2  ;;  %v1200_v53 = vmul.f32 %v3707_v60, %v3707_v60  ;;  %v1154_v55 = vadd.f32 1.1920929e-07, %v1143_v33 }
 0x18b   :  { %v877_v36 = vpop.f32.mrb[50].mxu0  ;;  %2441 = vmatprep.mubr.f32.mxu1 %v1166_v31  ;;  %v1220_v59 = vmul.f32 %v3711_v52, %v3711_v52  ;;  %v1145_v10 = vmul.f32 %v2663_v4, %v3666_v34 }
 0x18c   :  { %v878_v0 = vadd.f32 %v877_v36, %v3431_v63  ;;  %v879_v48 = vpop.f32.mrb[51].mxu0  ;;  %v2665_v7 = vpop.eup %2664  ;;  %2668 = vrcp.f32 %v1154_v55 }
 0x18d   :  { %v880_v11 = vadd.f32 %v879_v48, %v3433_v6  ;;  %v3732_v58 = vadd.f32 %v1220_v59, %v1200_v53  ;;  %v1147_v39 = vsel %vm1146_vm10, %v3666_v34, %v1145_v10  ;;  %v1167_v9 = vmul.f32 %v2665_v7, %v3533_v42 }
 0x18e   :  { %v1201_v61 = vmul.f32 %v878_v0, %v878_v0  ;;  %v1276_v24 = vmul.f32 %v878_v0, %v3635_v23  ;;  %v1150_v1 = vsel %vm1148_vm11, %v1149_v41, %v1147_v39  ;;  %v3739_v45 = vmul.f32 %v2665_v7, %v3561_v5 }
 0x18f   :  { %v1221_v2 = vmul.f32 %v880_v11, %v880_v11  ;;  %v1281_v63 = vmul.f32 %v880_v11, %v3638_v20  ;;  %v883_v56 = vpop.f32.mrb[52].mxu0  ;;  %v1155_v26 = vadd.f32 1.1920929e-07, %v1150_v1  ;;  %2442 = vmatmul.mubr.f32.gmra.mrb[64].mxu1 %v1167_v9  ;;  %v3743_v34 = vmul.f32 %v2665_v7, %v3605_v28 }
 0x190   :  { %v884_v6 = vadd.f32 %v883_v56, %v3435_v15  ;;  %v885_v14 = vpop.f32.mrb[53].mxu0  ;;  %v2667_v62 = vpop.eup %2666 }
 0x191   :  { %v3745_v51 = vadd.f32 %v1281_v63, %v1276_v24  ;;  %v886_v42 = vadd.f32 %v885_v14, %v3437_v21  ;;  %v3748_v22 = vadd.f32 %v1221_v2, %v1201_v61  ;;  %2670 = vrcp.f32 %v1155_v26 }
 0x192   :  { %v1202_v31 = vmul.f32 %v884_v6, %v884_v6  ;;  %v1277_v33 = vmul.f32 %v884_v6, %v3655_v50  ;;  %v1168_v4 = vmul.f32 %v2667_v62, %v3541_v43  ;;  %v1178_v36 = vmul.f32 %v2667_v62, %v3569_v3 }
 0x193   :  { %v1222_v5 = vmul.f32 %v886_v42, %v886_v42  ;;  %v1282_v53 = vmul.f32 %v886_v42, %v3659_v17  ;;  %v889_v15 = vpop.f32.mrb[54].mxu0  ;;  %v3756_v21 = vmul.f32 %v2667_v62, %v3613_v13  ;;  %v3993_v42 = vld [vmem:[#allocation26_spill] sm:$0xff]  ;;  %v3994_v62 = vld [vmem:[#allocation27_spill] sm:$0xff] }
 0x194   :  { %v890_v28 = vadd.f32 %v889_v15, %v3439_v25  ;;  %v891_v55 = vpop.f32.mrb[55].mxu0  ;;  %2444 = vmatprep.mubr.f32.mxu1 %v1168_v4 }
 0x195   :  { %v3758_v59 = vadd.f32 %v1282_v53, %v1277_v33  ;;  %v892_v10 = vadd.f32 %v891_v55, %v3441_v44  ;;  %v3761_v0 = vadd.f32 %v1222_v5, %v1202_v31 }
 0x196   :  { %v1203_v48 = vmul.f32 %v890_v28, %v890_v28  ;;  %v1278_v7 = vmul.f32 %v890_v28, %v3671_v49  ;;  %v2669_v41 = vpop.eup %2668 }
 0x197   :  { %v1223_v43 = vmul.f32 %v892_v10, %v892_v10  ;;  %v1283_v25 = vmul.f32 %v892_v10, %v3678_v57  ;;  %v895_v11 = vpop.f32.mrb[56].mxu0  ;;  %v1169_v13 = vmul.f32 %v2669_v41, %v3545_v18  ;;  %v1179_v61 = vmul.f32 %v2669_v41, %v3579_v47 }
 0x198   :  { %v896_v3 = vadd.f32 %v895_v11, %v3443_v27  ;;  %v897_v39 = vpop.f32.mrb[57].mxu0  ;;  %v3769_v24 = vmul.f32 %v2669_v41, %v3627_v32 }
 0x199   :  { %v3771_v44 = vadd.f32 %v1283_v25, %v1278_v7  ;;  %v898_v9 = vadd.f32 %v897_v39, %v3445_v29  ;;  %v3774_v1 = vadd.f32 %v1223_v43, %v1203_v48  ;;  %2445 = vmatmul.mubr.f32.gmra.mrb[66].mxu1 %v1169_v13  ;;  %v3996_v7 = vld [vmem:[#allocation7_spill] sm:$0xff] }
 0x19a   :  { %v1204_v2 = vmul.f32 %v896_v3, %v896_v3  ;;  %v1279_v63 = vmul.f32 %v896_v3, %v3689_v35 }
 0x19b   :  { %v1224_v56 = vmul.f32 %v898_v9, %v898_v9  ;;  %v1284_v27 = vmul.f32 %v898_v9, %v3694_v37  ;;  %v901_v26 = vpop.f32.mrb[58].mxu0  ;;  %v2671_v18 = vpop.eup %2670 }
 0x19c   :  { %v902_v47 = vadd.f32 %v901_v26, %v3447_v30  ;;  %v903_v6 = vpop.f32.mrb[59].mxu0  ;;  %v1170_v29 = vmul.f32 %v2671_v18, %v3993_v42  ;;  %v1180_v31 = vmul.f32 %v2671_v18, %v3994_v62  ;;  %v3786_v53 = vmul.f32 %v2671_v18, %v3643_v16  ;;  %v3999_v42 = vld [vmem:[#allocation10_spill] sm:$0xff] }
 0x19d   :  { %v3779_v32 = vadd.f32 %v1284_v27, %v1279_v63  ;;  %v904_v14 = vadd.f32 %v903_v6, %v3449_v12  ;;  %v3788_v15 = vadd.f32 %v1224_v56, %v1204_v2  ;;  %v3995_v12 = vld [vmem:[#allocation6_spill] sm:$0xff]  ;;  %v3998_v63 = vld [vmem:[#allocation9_spill] sm:$0xff]  ;;  %v1321_v18 = vmul.f32 %v3745_v51, %v3745_v51 }
 0x19e   :  { %v1205_v33 = vmul.f32 %v902_v47, %v902_v47  ;;  %v1280_v5 = vmul.f32 %v902_v47, %v3707_v60  ;;  %2447 = vmatprep.mubr.f32.mxu1 %v1170_v29 }
 0x19f   :  { %v1225_v4 = vmul.f32 %v904_v14, %v904_v14  ;;  %v1285_v30 = vmul.f32 %v904_v14, %v3711_v52  ;;  %v907_v28 = vpop.f32.mrb[60].mxu0  ;;  %2448 = vmatmul.mubr.f32.gmra.mrb[68].mxu1 %v3715_v46  ;;  %v3997_v46 = vld [vmem:[#allocation8_spill] sm:$0xff] }
 0x1a0   :  { %v908_v55 = vadd.f32 %v907_v28, %v3995_v12  ;;  %v909_v10 = vpop.f32.mrb[61].mxu0  ;;  %2450 = vmatprep.mubr.f32.mxu1 %v3739_v45 }
 0x1a1   :  { %v3793_v48 = vadd.f32 %v1285_v30, %v1280_v5  ;;  %v910_v41 = vadd.f32 %v909_v10, %v3996_v7  ;;  %v3797_v16 = vadd.f32 %v1225_v4, %v1205_v33  ;;  %v4000_v5 = vld [vmem:[#allocation11_spill] sm:$0xff] }
 0x1a2   :  { %v1206_v43 = vmul.f32 %v908_v55, %v908_v55  ;;  %v1291_v25 = vmul.f32 %v908_v55, %v3635_v23  ;;  %v1322_v55 = vmul.f32 %v3758_v59, %v3758_v59 }
 0x1a3   :  { %v1226_v11 = vmul.f32 %v910_v41, %v910_v41  ;;  %v1296_v3 = vmul.f32 %v910_v41, %v3638_v20  ;;  %v913_v39 = vpop.f32.mrb[62].mxu0  ;;  %2451 = vmatmul.mubr.f32.gmra.mrb[70].mxu1 %v1178_v36 }
 0x1a4   :  { %v914_v13 = vadd.f32 %v913_v39, %v3997_v46  ;;  %v915_v9 = vpop.f32.mrb[63].mxu0  ;;  %2453 = vmatprep.mubr.f32.mxu1 %v1179_v61  ;;  %v4002_v39 = vld [vmem:[#allocation13_spill] sm:$0xff] }
 0x1a5   :  { %v3802_v2 = vadd.f32 %v1296_v3, %v1291_v25  ;;  %v916_v45 = vadd.f32 %v915_v9, %v3998_v63  ;;  %v3805_v56 = vadd.f32 %v1226_v11, %v1206_v43 }
 0x1a6   :  { %v1207_v27 = vmul.f32 %v914_v13, %v914_v13  ;;  %v1292_v26 = vmul.f32 %v914_v13, %v3655_v50 }
 0x1a7   :  { %v1326_v47 = vmul.f32 %v3802_v2, %v3802_v2  ;;  %v1227_v36 = vmul.f32 %v916_v45, %v916_v45  ;;  %v1297_v6 = vmul.f32 %v916_v45, %v3659_v17  ;;  %v919_v14 = vpop.f32.mrb[64].mxu0  ;;  %2454 = vmatmul.mubr.f32.gmra.mrb[72].mxu1 %v1180_v31  ;;  %v1323_v45 = vmul.f32 %v3771_v44, %v3771_v44 }
 0x1a8   :  { %v920_v61 = vadd.f32 %v919_v14, %v3999_v42  ;;  %v921_v29 = vpop.f32.mrb[65].mxu0  ;;  %2456 = vmatprep.mubr.f32.mxu1 %v3718_v8  ;;  %v4001_v8 = vld [vmem:[#allocation12_spill] sm:$0xff]  ;;  %v4004_v42 = vld [vmem:[#allocation15_spill] sm:$0xff] }
 0x1a9   :  { %v3814_v62 = vadd.f32 %v1326_v47, %v1321_v18  ;;  %v3816_v33 = vadd.f32 %v1297_v6, %v1292_v26  ;;  %v922_v4 = vadd.f32 %v921_v29, %v4000_v5  ;;  %v3820_v30 = vadd.f32 %v1227_v36, %v1207_v27 }
 0x1aa   :  { %v1208_v28 = vmul.f32 %v920_v61, %v920_v61  ;;  %v1293_v12 = vmul.f32 %v920_v61, %v3671_v49 }
 0x1ab   :  { %v1327_v31 = vmul.f32 %v3816_v33, %v3816_v33  ;;  %v1228_v10 = vmul.f32 %v922_v4, %v922_v4  ;;  %v1298_v7 = vmul.f32 %v922_v4, %v3678_v57  ;;  %v925_v41 = vpop.f32.mrb[66].mxu0  ;;  %2457 = vmatmul.mubr.f32.gmra.mrb[74].mxu1 %v3743_v34 }
 0x1ac   :  { %v926_v43 = vadd.f32 %v925_v41, %v4001_v8  ;;  %v927_v25 = vpop.f32.mrb[67].mxu0  ;;  %2459 = vmatprep.mubr.f32.mxu1 %v3756_v21  ;;  %v4003_v21 = vld [vmem:[#allocation14_spill] sm:$0xff] }
 0x1ad   :  { %v3830_v11 = vadd.f32 %v1327_v31, %v1322_v55  ;;  %v3832_v3 = vadd.f32 %v1298_v7, %v1293_v12  ;;  %v928_v46 = vadd.f32 %v927_v25, %v4002_v39  ;;  %v3836_v13 = vadd.f32 %v1228_v10, %v1208_v28 }
 0x1ae   :  { %v1209_v9 = vmul.f32 %v926_v43, %v926_v43  ;;  %v1294_v63 = vmul.f32 %v926_v43, %v3689_v35  ;;  %v1324_v28 = vmul.f32 %v3779_v32, %v3779_v32  ;;  %v4006_v43 = vld [vmem:[#allocation17_spill] sm:$0xff] }
 0x1af   :  { %v1328_v34 = vmul.f32 %v3832_v3, %v3832_v3  ;;  %v1229_v27 = vmul.f32 %v928_v46, %v928_v46  ;;  %v1299_v26 = vmul.f32 %v928_v46, %v3694_v37  ;;  %v931_v18 = vpop.f32.mrb[68].mxu0  ;;  %2460 = vmatmul.mubr.f32.gmra.mrb[76].mxu1 %v3769_v24 }
 0x1b0   :  { %v932_v47 = vadd.f32 %v931_v18, %v4003_v21  ;;  %v933_v36 = vpop.f32.mrb[69].mxu0  ;;  %2462 = vmatprep.mubr.f32.mxu1 %v3786_v53  ;;  %v4005_v53 = vld [vmem:[#allocation16_spill] sm:$0xff] }
 0x1b1   :  { %v3846_v6 = vadd.f32 %v1328_v34, %v1323_v45  ;;  %v3848_v14 = vadd.f32 %v1299_v26, %v1294_v63  ;;  %v934_v61 = vadd.f32 %v933_v36, %v4004_v42  ;;  %v3852_v29 = vadd.f32 %v1229_v27, %v1209_v9 }
 0x1b2   :  { %v1210_v5 = vmul.f32 %v932_v47, %v932_v47  ;;  %v1295_v4 = vmul.f32 %v932_v47, %v3707_v60  ;;  %v1325_v63 = vmul.f32 %v3793_v48, %v3793_v48 }
 0x1b3   :  { %v1329_v24 = vmul.f32 %v3848_v14, %v3848_v14  ;;  %v1230_v12 = vmul.f32 %v934_v61, %v934_v61  ;;  %v1300_v55 = vmul.f32 %v934_v61, %v3711_v52  ;;  %v937_v31 = vpop.f32.mrb[70].mxu0  ;;  %2463 = vmatmul.mubr.f32.gmra.mrb[78].mxu1 %v3661_v40 }
 0x1b4   :  { %v938_v10 = vadd.f32 %v937_v31, %v4005_v53  ;;  %v939_v7 = vpop.f32.mrb[71].mxu0  ;;  %2465 = vmatprep.mubr.f32.mxu1 %v3680_v38  ;;  %v4007_v38 = vld [vmem:[#allocation18_spill] sm:$0xff]  ;;  %v4010_v53 = vld [vmem:[#allocation21_spill] sm:$0xff] }
 0x1b5   :  { %v3862_v41 = vadd.f32 %v1329_v24, %v1324_v28  ;;  %v3864_v8 = vadd.f32 %v1300_v55, %v1295_v4  ;;  %v940_v25 = vadd.f32 %v939_v7, %v4006_v43  ;;  %v3868_v39 = vadd.f32 %v1230_v12, %v1210_v5  ;;  %v4009_v24 = vld [vmem:[#allocation20_spill] sm:$0xff] }
 0x1b6   :  { %v1211_v46 = vmul.f32 %v938_v10, %v938_v10  ;;  %v1306_v9 = vmul.f32 %v938_v10, %v3635_v23  ;;  %v4008_v23 = vld [vmem:[#allocation19_spill] sm:$0xff] }
 0x1b7   :  { %v1330_v40 = vmul.f32 %v3864_v8, %v3864_v8  ;;  %v1231_v45 = vmul.f32 %v940_v25, %v940_v25  ;;  %v1311_v34 = vmul.f32 %v940_v25, %v3638_v20  ;;  %v943_v27 = vpop.f32.mrb[72].mxu0  ;;  %2466 = vmatmul.mubr.f32.gmra.mrb[80].mxu1 %v3696_v19 }
 0x1b8   :  { %v944_v26 = vadd.f32 %v943_v27, %v4007_v38  ;;  %v945_v18 = vpop.f32.mrb[73].mxu0  ;;  %2468 = vmatprep.mubr.f32.mxu1 %v3720_v54 }
 0x1b9   :  { %v3878_v21 = vadd.f32 %v1330_v40, %v1325_v63  ;;  %v3880_v47 = vadd.f32 %v1311_v34, %v1306_v9  ;;  %v946_v36 = vadd.f32 %v945_v18, %v4008_v23  ;;  %v3884_v42 = vadd.f32 %v1231_v45, %v1211_v46  ;;  %v4012_v63 = vld [vmem:[#allocation23_spill] sm:$0xff] }
 0x1ba   :  { %v1212_v61 = vmul.f32 %v944_v26, %v944_v26  ;;  %v1307_v5 = vmul.f32 %v944_v26, %v3655_v50 }
 0x1bb   :  { %v1336_v20 = vmul.f32 %v3880_v47, %v3880_v47  ;;  %v1232_v19 = vmul.f32 %v946_v36, %v946_v36  ;;  %v1312_v4 = vmul.f32 %v946_v36, %v3659_v17  ;;  %v949_v28 = vpop.f32.mrb[74].mxu0  ;;  %2469 = vmatmul.mubr.f32.gmra.mrb[82].mxu1 %v3732_v58 }
 0x1bc   :  { %v950_v12 = vadd.f32 %v949_v28, %v4009_v24  ;;  %v951_v55 = vpop.f32.mrb[75].mxu0  ;;  %2471 = vmatprep.mubr.f32.mxu1 %v3748_v22 }
 0x1bd   :  { %v1341_v54 = vadd.f32 %v1336_v20, %v3814_v62  ;;  %v3893_v31 = vadd.f32 %v1312_v4, %v1307_v5  ;;  %v952_v50 = vadd.f32 %v951_v55, %v4010_v53  ;;  %v3897_v10 = vadd.f32 %v1232_v19, %v1212_v61  ;;  %v4011_v62 = vld [vmem:[#allocation22_spill] sm:$0xff]  ;;  %v4014_v61 = vld [vmem:[#allocation25_spill] sm:$0xff] }
 0x1be   :  { %v1308_v7 = vmul.f32 %v950_v12, %v3671_v49  ;;  %v1213_v17 = vmul.f32 %v950_v12, %v950_v12 }
 0x1bf   :  { %2672 = vrsqrt.f32 %v1341_v54  ;;  %v955_v43 = vpop.f32.mrb[76].mxu0  ;;  %v1337_v58 = vmul.f32 %v3893_v31, %v3893_v31  ;;  %v1233_v25 = vmul.f32 %v952_v50, %v952_v50  ;;  %v1313_v46 = vmul.f32 %v952_v50, %v3678_v57  ;;  %2472 = vmatmul.mubr.f32.gmra.mrb[84].mxu1 %v3761_v0 }
 0x1c0   :  { %v956_v9 = vadd.f32 %v955_v43, %v4011_v62  ;;  %v957_v22 = vpop.f32.mrb[77].mxu0  ;;  %2474 = vmatprep.mubr.f32.mxu1 %v3774_v1  ;;  %vm1348_vm12 = vcmp.eq.f32.partialorder %v1341_v54, inf  ;;  %v1351_v53 = vand.u32 2147483648, %v1341_v54  ;;  %vm1350_vm13 = vcmp.eq.f32.partialorder %v1341_v54, 0.0 }
 0x1c1   :  { %v958_v40 = vadd.f32 %v957_v22, %v4012_v63  ;;  %v1342_v49 = vadd.f32 %v1337_v58, %v3830_v11  ;;  %v3908_v45 = vadd.f32 %v1313_v46, %v1308_v7  ;;  %v1253_v18 = vadd.f32 %v1233_v25, %v1213_v17  ;;  %v4013_v11 = vld [vmem:[#allocation24_spill] sm:$0xff] }
 0x1c2   :  { %v1214_v34 = vmul.f32 %v956_v9, %v956_v9  ;;  %v1309_v27 = vmul.f32 %v956_v9, %v3689_v35 }
 0x1c3   :  { %v1234_v38 = vmul.f32 %v958_v40, %v958_v40  ;;  %v1314_v26 = vmul.f32 %v958_v40, %v3694_v37  ;;  %v961_v57 = vpop.f32.mrb[78].mxu0  ;;  %2674 = vrsqrt.f32 %v1342_v49  ;;  %2475 = vmatmul.mubr.f32.gmra.mrb[86].mxu1 %v3788_v15  ;;  %v1338_v1 = vmul.f32 %v3908_v45, %v3908_v45 }
 0x1c4   :  { %v963_v0 = vpop.f32.mrb[79].mxu0  ;;  %v962_v36 = vadd.f32 %v961_v57, %v4013_v11  ;;  %2477 = vmatprep.mubr.f32.mxu1 %v3797_v16  ;;  %vm1355_vm14 = vcmp.eq.f32.partialorder %v1342_v49, inf  ;;  %v1358_v17 = vand.u32 2147483648, %v1342_v49  ;;  %vm1357_vm15 = vcmp.eq.f32.partialorder %v1342_v49, 0.0 }
 0x1c5   :  { %v3915_v23 = vadd.f32 %v1314_v26, %v1309_v27  ;;  %v964_v35 = vadd.f32 %v963_v0, %v4014_v61  ;;  %v1254_v5 = vadd.f32 %v1234_v38, %v1214_v34  ;;  %v1343_v37 = vadd.f32 %v1338_v1, %v3846_v6 }
 0x1c6   :  { %v1215_v19 = vmul.f32 %v962_v36, %v962_v36  ;;  %v1310_v15 = vmul.f32 %v962_v36, %v3707_v60 }
 0x1c7   :  { %v1339_v20 = vmul.f32 %v3915_v23, %v3915_v23  ;;  %v1235_v4 = vmul.f32 %v964_v35, %v964_v35  ;;  %v1315_v28 = vmul.f32 %v964_v35, %v3711_v52  ;;  %2478 = vmatmul.mubr.f32.gmra.mrb[88].mxu1 %v3805_v56  ;;  %2676 = vrsqrt.f32 %v1343_v37 }
 0x1c8   :  { %2480 = vmatprep.mubr.f32.mxu1 %v3820_v30  ;;  %vm1362_vm0 = vcmp.eq.f32.partialorder %v1343_v37, inf  ;;  %vm1364_vm1 = vcmp.eq.f32.partialorder %v1343_v37, 0.0 }
 0x1c9   :  { %v2673_v24 = vpop.eup %2672  ;;  %v1344_v12 = vadd.f32 %v1339_v20, %v3862_v41  ;;  %v3928_v55 = vadd.f32 %v1315_v28, %v1310_v15  ;;  %v1255_v6 = vadd.f32 %v1235_v4, %v1215_v19 }
 0x1ca   :  { %v1347_v16 = vmul.f32 %v2673_v24, %v1341_v54 }
 0x1cb   :  { %2678 = vrsqrt.f32 %v1344_v12  ;;  %2481 = vmatmul.mubr.f32.gmra.mrb[90].mxu1 %v3836_v13  ;;  %v1340_v52 = vmul.f32 %v3928_v55, %v3928_v55  ;;  %vm1369_vm2 = vcmp.eq.f32.partialorder %v1344_v12, inf  ;;  %v1372_v22 = vand.u32 2147483648, %v1344_v12 }
 0x1cc   :  { %v1349_v50 = vsel %vm1348_vm12, %v1341_v54, %v1347_v16  ;;  %2483 = vmatprep.mubr.f32.mxu1 %v3852_v29  ;;  %v1365_v29 = vand.u32 2147483648, %v1343_v37  ;;  %vm1371_vm3 = vcmp.eq.f32.partialorder %v1344_v12, 0.0 }
 0x1cd   :  { %v1352_v60 = vsel %vm1350_vm13, %v1351_v53, %v1349_v50  ;;  %v2675_v56 = vpop.eup %2674  ;;  %v1345_v41 = vadd.f32 %v1340_v52, %v3878_v21 }
 0x1ce   :  { %v1381_v30 = vadd.f32 1.1920929e-07, %v1352_v60  ;;  %v1354_v7 = vmul.f32 %v2675_v56, %v1342_v49 }
 0x1cf   :  { %2484 = vmatmul.mubr.f32.gmra.mrb[92].mxu1 %v3868_v39  ;;  %vm1376_vm4 = vcmp.eq.f32.partialorder %v1345_v41, inf  ;;  %v1379_v57 = vand.u32 2147483648, %v1345_v41  ;;  %vm1378_vm5 = vcmp.eq.f32.partialorder %v1345_v41, 0.0 }
 0x1d0   :  { %2680 = vrcp.f32 %v1381_v30  ;;  %v1356_v54 = vsel %vm1355_vm14, %v1342_v49, %v1354_v7  ;;  %2486 = vmatprep.mubr.f32.mxu1 %v3884_v42 }
 0x1d1   :  { %2682 = vrsqrt.f32 %v1345_v41  ;;  %v1359_v13 = vsel %vm1357_vm15, %v1358_v17, %v1356_v54  ;;  %v2677_v43 = vpop.eup %2676 }
 0x1d2   :  { %v1382_v58 = vadd.f32 1.1920929e-07, %v1359_v13  ;;  %v1361_v25 = vmul.f32 %v2677_v43, %v1343_v37 }
 0x1d3   :  { %2487 = vmatmul.mubr.f32.gmra.mrb[94].mxu1 %v3897_v10 }
 0x1d4   :  { %2489 = vmatprep.mubr.f32.mxu1 %v1253_v18  ;;  %2684 = vrcp.f32 %v1382_v58  ;;  %v1363_v46 = vsel %vm1362_vm0, %v1343_v37, %v1361_v25 }
 0x1d5   :  { %v2679_v21 = vpop.eup %2678  ;;  %v1366_v39 = vsel %vm1364_vm1, %v1365_v29, %v1363_v46 }
 0x1d6   :  { %v1368_v62 = vmul.f32 %v2679_v21, %v1344_v12  ;;  %v1383_v9 = vadd.f32 1.1920929e-07, %v1366_v39 }
 0x1d7   :  { %2490 = vmatmul.mubr.f32.gmra.mrb[96].mxu1 %v1254_v5 }
 0x1d8   :  { %v1370_v42 = vsel %vm1369_vm2, %v1344_v12, %v1368_v62  ;;  %2492 = vmatprep.mubr.f32.mxu1 %v1255_v6  ;;  %2686 = vrcp.f32 %v1383_v9 }
 0x1d9   :  { %v1373_v40 = vsel %vm1371_vm3, %v1372_v22, %v1370_v42 }
 0x1da   :  { %v2681_v63 = vpop.eup %2680  ;;  %v1384_v49 = vadd.f32 1.1920929e-07, %v1373_v40 }
 0x1db   :  { %v2683_v10 = vpop.eup %2682  ;;  %v1396_v34 = vmul.f32 %v2681_v63, %v3745_v51  ;;  %v1406_v27 = vmul.f32 %v2681_v63, %v3802_v2  ;;  %v1416_v38 = vmul.f32 %v2681_v63, %v3880_v47 }
 0x1dc   :  { %v1375_v26 = vmul.f32 %v2683_v10, %v1345_v41  ;;  %2688 = vrcp.f32 %v1384_v49 }
 0x1dd   :  { %2493 = vmatmul.mubr.f32.gmra.mrb[98].mxu1 %v1396_v34 }
 0x1de   :  { %v1377_v18 = vsel %vm1376_vm4, %v1345_v41, %v1375_v26  ;;  %v2685_v0 = vpop.eup %2684 }
 0x1df   :  { %v1380_v1 = vsel %vm1378_vm5, %v1379_v57, %v1377_v18  ;;  %v1397_v36 = vmul.f32 %v2685_v0, %v3758_v59  ;;  %v1407_v61 = vmul.f32 %v2685_v0, %v3816_v33  ;;  %v1417_v51 = vmul.f32 %v2685_v0, %v3893_v31 }
 0x1e0   :  { %v1385_v11 = vadd.f32 1.1920929e-07, %v1380_v1 }
 0x1e1   :  { %2495 = vmatprep.mubr.f32.mxu1 %v1397_v36 }
 0x1e2   :  { %2690 = vrcp.f32 %v1385_v11  ;;  %v2687_v2 = vpop.eup %2686 }
 0x1e3   :  { %v1398_v47 = vmul.f32 %v2687_v2, %v3771_v44  ;;  %v1408_v35 = vmul.f32 %v2687_v2, %v3832_v3  ;;  %v1418_v5 = vmul.f32 %v2687_v2, %v3908_v45 }
 0x1e5   :  { %2496 = vmatmul.mubr.f32.gmra.mrb[100].mxu1 %v1398_v47 }
 0x1e6   :  { %v2689_v37 = vpop.eup %2688 }
 0x1e7   :  { %v1399_v20 = vmul.f32 %v2689_v37, %v3779_v32  ;;  %v1409_v19 = vmul.f32 %v2689_v37, %v3848_v14  ;;  %v1419_v59 = vmul.f32 %v2689_v37, %v3915_v23 }
 0x1e9   :  { %2498 = vmatprep.mubr.f32.mxu1 %v1399_v20 }
 0x1ec   :  { %v2691_v33 = vpop.eup %2690 }
 0x1ed   :  { %v1400_v31 = vmul.f32 %v2691_v33, %v3793_v48  ;;  %v1410_v15 = vmul.f32 %v2691_v33, %v3864_v8  ;;  %v1420_v44 = vmul.f32 %v2691_v33, %v3928_v55 }
 0x1ef   :  { %2499 = vmatmul.mubr.f32.gmra.mrb[102].mxu1 %v1400_v31 }
 0x1f0   :  { %2501 = vmatprep.mubr.f32.mxu1 %v1406_v27 }
 0x1f3   :  { %2502 = vmatmul.mubr.f32.gmra.mrb[104].mxu1 %v1407_v61 }
 0x1f4   :  { %2504 = vmatprep.mubr.f32.mxu1 %v1408_v35 }
 0x1f7   :  { %2505 = vmatmul.mubr.f32.gmra.mrb[106].mxu1 %v1409_v19 }
 0x1f8   :  { %2507 = vmatprep.mubr.f32.mxu1 %v1410_v15 }
 0x1fb   :  { %2508 = vmatmul.mubr.f32.gmra.mrb[108].mxu1 %v1416_v38 }
 0x1fc   :  { %2510 = vmatprep.mubr.f32.mxu1 %v1417_v51 }
 0x1ff   :  { %2511 = vmatmul.mubr.f32.gmra.mrb[110].mxu1 %v1418_v5 }
 0x200   :  { %2513 = vmatprep.mubr.f32.mxu1 %v1419_v59 }
 0x203   :  { %2514 = vmatmul.mubr.f32.gmra.mrb[112].mxu1 %v1420_v44 }
 0x204   :  { %v2413_v32 = vpop.f32.mrb[44].mxu1 }
 0x205   :  { %v1928_v3 = vmax.f32 %v2413_v32, 1e-10  ;;  %v1578_v14 = vpop.f32.mrb[45].mxu1 }
 0x206   :  { %v1927_v45 = vmax.f32 %v1578_v14, 1e-10 }
 0x207   :  { %2692 = vlog2.f32 %v1928_v3 }
 0x208   :  { %2694 = vlog2.f32 %v1927_v45 }
 0x20c   :  { %v2416_v48 = vpop.f32.mrb[46].mxu1 }
 0x20d   :  { %v1930_v8 = vmax.f32 %v2416_v48, 1e-10  ;;  %v1588_v23 = vpop.f32.mrb[47].mxu1 }
 0x20e   :  { %v1929_v4 = vmax.f32 %v1588_v23, 1e-10 }
 0x20f   :  { %2696 = vlog2.f32 %v1930_v8 }
 0x210   :  { %2698 = vlog2.f32 %v1929_v4 }
 0x211   :  { %v2693_v28 = vpop.eup %2692 }
 0x212   :  { %v2695_v24 = vpop.eup %2694  ;;  %v1950_v16 = vmul.f32 0.6931472, %v2693_v28 }
 0x213   :  { %v1948_v12 = vmul.f32 0.6931472, %v2695_v24 }
 0x214   :  { %v1988_v55 = vmul.f32 0.4342945, %v1950_v16  ;;  %v2419_v6 = vpop.f32.mrb[48].mxu1 }
 0x215   :  { %v1987_v53 = vmul.f32 0.4342945, %v1948_v12  ;;  %v1932_v50 = vmax.f32 %v2419_v6, 1e-10  ;;  %v1598_v60 = vpop.f32.mrb[49].mxu1 }
 0x216   :  { %v2008_v52 = vmul.f32 10.0, %v1988_v55  ;;  %v1931_v56 = vmax.f32 %v1598_v60, 1e-10 }
 0x217   :  { %v2007_v30 = vmul.f32 10.0, %v1987_v53  ;;  %2700 = vlog2.f32 %v1932_v50 }
 0x218   :  { %2028 = vst [vmem:[#allocation3 + $0x8] sm:$0xff] %v2008_v52  ;;  %2702 = vlog2.f32 %v1931_v56 }
 0x219   :  { %v2697_v7 = vpop.eup %2696  ;;  %2027 = vst [vmem:[#allocation3] sm:$0xff] %v2007_v30 }
 0x21a   :  { %v2699_v41 = vpop.eup %2698  ;;  %v1954_v17 = vmul.f32 0.6931472, %v2697_v7 }
 0x21b   :  { %v1952_v54 = vmul.f32 0.6931472, %v2699_v41 }
 0x21c   :  { %v1990_v13 = vmul.f32 0.4342945, %v1954_v17  ;;  %v2422_v43 = vpop.f32.mrb[50].mxu1 }
 0x21d   :  { %v1989_v58 = vmul.f32 0.4342945, %v1952_v54  ;;  %v1934_v25 = vmax.f32 %v2422_v43, 1e-10  ;;  %v1608_v29 = vpop.f32.mrb[51].mxu1 }
 0x21e   :  { %v2010_v21 = vmul.f32 10.0, %v1990_v13  ;;  %v1933_v46 = vmax.f32 %v1608_v29, 1e-10 }
 0x21f   :  { %v2009_v39 = vmul.f32 10.0, %v1989_v58  ;;  %2704 = vlog2.f32 %v1934_v25 }
 0x220   :  { %2030 = vst [vmem:[#allocation3 + $0x18] sm:$0xff] %v2010_v21  ;;  %2706 = vlog2.f32 %v1933_v46 }
 0x221   :  { %v2701_v62 = vpop.eup %2700  ;;  %2029 = vst [vmem:[#allocation3 + $0x10] sm:$0xff] %v2009_v39 }
 0x222   :  { %v2703_v9 = vpop.eup %2702  ;;  %v1958_v22 = vmul.f32 0.6931472, %v2701_v62 }
 0x223   :  { %v1956_v42 = vmul.f32 0.6931472, %v2703_v9 }
 0x224   :  { %v1992_v63 = vmul.f32 0.4342945, %v1958_v22  ;;  %v2425_v40 = vpop.f32.mrb[52].mxu1 }
 0x225   :  { %v1991_v10 = vmul.f32 0.4342945, %v1956_v42  ;;  %v1936_v49 = vmax.f32 %v2425_v40, 1e-10  ;;  %v1618_v34 = vpop.f32.mrb[53].mxu1 }
 0x226   :  { %v2012_v27 = vmul.f32 10.0, %v1992_v63  ;;  %v1935_v38 = vmax.f32 %v1618_v34, 1e-10 }
 0x227   :  { %v2011_v26 = vmul.f32 10.0, %v1991_v10  ;;  %2708 = vlog2.f32 %v1936_v49 }
 0x228   :  { %2032 = vst [vmem:[#allocation3 + $0x28] sm:$0xff] %v2012_v27  ;;  %2710 = vlog2.f32 %v1935_v38 }
 0x229   :  { %v2705_v57 = vpop.eup %2704  ;;  %2031 = vst [vmem:[#allocation3 + $0x20] sm:$0xff] %v2011_v26 }
 0x22a   :  { %v2707_v18 = vpop.eup %2706  ;;  %v1962_v0 = vmul.f32 0.6931472, %v2705_v57 }
 0x22b   :  { %v1960_v1 = vmul.f32 0.6931472, %v2707_v18 }
 0x22c   :  { %v1994_v11 = vmul.f32 0.4342945, %v1962_v0  ;;  %v2428_v36 = vpop.f32.mrb[54].mxu1 }
 0x22d   :  { %v1993_v61 = vmul.f32 0.4342945, %v1960_v1  ;;  %v1938_v51 = vmax.f32 %v2428_v36, 1e-10  ;;  %v1628_v2 = vpop.f32.mrb[55].mxu1 }
 0x22e   :  { %v2014_v47 = vmul.f32 10.0, %v1994_v11  ;;  %v1937_v35 = vmax.f32 %v1628_v2, 1e-10 }
 0x22f   :  { %v2013_v5 = vmul.f32 10.0, %v1993_v61  ;;  %2712 = vlog2.f32 %v1938_v51 }
 0x230   :  { %2034 = vst [vmem:[#allocation3 + $0x38] sm:$0xff] %v2014_v47  ;;  %2714 = vlog2.f32 %v1937_v35 }
 0x231   :  { %v2709_v37 = vpop.eup %2708  ;;  %2033 = vst [vmem:[#allocation3 + $0x30] sm:$0xff] %v2013_v5 }
 0x232   :  { %v2711_v20 = vpop.eup %2710  ;;  %v1966_v19 = vmul.f32 0.6931472, %v2709_v37 }
 0x233   :  { %v1964_v59 = vmul.f32 0.6931472, %v2711_v20 }
 0x234   :  { %v1996_v33 = vmul.f32 0.4342945, %v1966_v19  ;;  %v2431_v31 = vpop.f32.mrb[56].mxu1 }
 0x235   :  { %v1995_v15 = vmul.f32 0.4342945, %v1964_v59  ;;  %v1940_v44 = vmax.f32 %v2431_v31, 1e-10  ;;  %v1638_v32 = vpop.f32.mrb[57].mxu1 }
 0x236   :  { %v2016_v3 = vmul.f32 10.0, %v1996_v33  ;;  %v1939_v14 = vmax.f32 %v1638_v32, 1e-10 }
 0x237   :  { %v2015_v45 = vmul.f32 10.0, %v1995_v15  ;;  %2716 = vlog2.f32 %v1940_v44 }
 0x238   :  { %2036 = vst [vmem:[#allocation3 + $0x48] sm:$0xff] %v2016_v3  ;;  %2718 = vlog2.f32 %v1939_v14 }
 0x239   :  { %v2713_v48 = vpop.eup %2712  ;;  %2035 = vst [vmem:[#allocation3 + $0x40] sm:$0xff] %v2015_v45 }
 0x23a   :  { %v2715_v8 = vpop.eup %2714  ;;  %v1970_v23 = vmul.f32 0.6931472, %v2713_v48 }
 0x23b   :  { %v1968_v4 = vmul.f32 0.6931472, %v2715_v8 }
 0x23c   :  { %v1998_v28 = vmul.f32 0.4342945, %v1970_v23  ;;  %v2434_v24 = vpop.f32.mrb[58].mxu1 }
 0x23d   :  { %v1997_v16 = vmul.f32 0.4342945, %v1968_v4  ;;  %v1942_v12 = vmax.f32 %v2434_v24, 1e-10  ;;  %v1648_v55 = vpop.f32.mrb[59].mxu1 }
 0x23e   :  { %v2018_v6 = vmul.f32 10.0, %v1998_v28  ;;  %v1941_v53 = vmax.f32 %v1648_v55, 1e-10 }
 0x23f   :  { %v2017_v50 = vmul.f32 10.0, %v1997_v16  ;;  %2720 = vlog2.f32 %v1942_v12 }
 0x240   :  { %2038 = vst [vmem:[#allocation3 + $0x58] sm:$0xff] %v2018_v6  ;;  %2722 = vlog2.f32 %v1941_v53 }
 0x241   :  { %v2717_v60 = vpop.eup %2716  ;;  %2037 = vst [vmem:[#allocation3 + $0x50] sm:$0xff] %v2017_v50 }
 0x242   :  { %v2719_v52 = vpop.eup %2718  ;;  %v1974_v56 = vmul.f32 0.6931472, %v2717_v60 }
 0x243   :  { %v1972_v30 = vmul.f32 0.6931472, %v2719_v52 }
 0x244   :  { %v2000_v7 = vmul.f32 0.4342945, %v1974_v56  ;;  %v2437_v17 = vpop.f32.mrb[60].mxu1 }
 0x245   :  { %v1999_v41 = vmul.f32 0.4342945, %v1972_v30  ;;  %v1944_v13 = vmax.f32 %v2437_v17, 1e-10  ;;  %v1658_v43 = vpop.f32.mrb[61].mxu1 }
 0x246   :  { %v2020_v54 = vmul.f32 10.0, %v2000_v7  ;;  %v1943_v25 = vmax.f32 %v1658_v43, 1e-10 }
 0x247   :  { %v2019_v58 = vmul.f32 10.0, %v1999_v41  ;;  %2724 = vlog2.f32 %v1944_v13 }
 0x248   :  { %2040 = vst [vmem:[#allocation3 + $0x68] sm:$0xff] %v2020_v54  ;;  %2726 = vlog2.f32 %v1943_v25 }
 0x249   :  { %v2721_v29 = vpop.eup %2720  ;;  %2039 = vst [vmem:[#allocation3 + $0x60] sm:$0xff] %v2019_v58 }
 0x24a   :  { %v2723_v21 = vpop.eup %2722  ;;  %v1978_v46 = vmul.f32 0.6931472, %v2721_v29 }
 0x24b   :  { %v1976_v39 = vmul.f32 0.6931472, %v2723_v21 }
 0x24c   :  { %v2002_v62 = vmul.f32 0.4342945, %v1978_v46 }
 0x24d   :  { %v2001_v9 = vmul.f32 0.4342945, %v1976_v39 }
 0x24e   :  { %v2022_v22 = vmul.f32 10.0, %v2002_v62  ;;  %v2440_v63 = vpop.f32.mrb[62].mxu1 }
 0x24f   :  { %v2021_v42 = vmul.f32 10.0, %v2001_v9  ;;  %v1946_v40 = vmax.f32 %v2440_v63, 1e-10  ;;  %v1668_v10 = vpop.f32.mrb[63].mxu1 }
 0x250   :  { %2042 = vst [vmem:[#allocation3 + $0x78] sm:$0xff] %v2022_v22  ;;  %v1945_v49 = vmax.f32 %v1668_v10, 1e-10 }
 0x251   :  { %2041 = vst [vmem:[#allocation3 + $0x70] sm:$0xff] %v2021_v42  ;;  %v2725_v34 = vpop.eup %2724  ;;  %2728 = vlog2.f32 %v1946_v40 }
 0x252   :  { %v2727_v27 = vpop.eup %2726  ;;  %v1982_v38 = vmul.f32 0.6931472, %v2725_v34  ;;  %2730 = vlog2.f32 %v1945_v49 }
 0x253   :  { %v1980_v26 = vmul.f32 0.6931472, %v2727_v27 }
 0x254   :  { %v2004_v57 = vmul.f32 0.4342945, %v1982_v38 }
 0x255   :  { %v2003_v18 = vmul.f32 0.4342945, %v1980_v26 }
 0x256   :  { %v2024_v0 = vmul.f32 10.0, %v2004_v57 }
 0x257   :  { %v2023_v1 = vmul.f32 10.0, %v2003_v18 }
 0x258   :  { %2044 = vst [vmem:[#allocation3 + $0x88] sm:$0xff] %v2024_v0 }
 0x259   :  { %2043 = vst [vmem:[#allocation3 + $0x80] sm:$0xff] %v2023_v1 }
 0x25b   :  { %v2729_v11 = vpop.eup %2728 }
 0x25c   :  { %v2731_v36 = vpop.eup %2730  ;;  %v1986_v61 = vmul.f32 0.6931472, %v2729_v11 }
 0x25d   :  { %v1984_v51 = vmul.f32 0.6931472, %v2731_v36 }
 0x25e   :  { %v2006_v2 = vmul.f32 0.4342945, %v1986_v61 }
 0x25f   :  { %v2005_v47 = vmul.f32 0.4342945, %v1984_v51 }
 0x260   :  { %v2026_v35 = vmul.f32 10.0, %v2006_v2 }
 0x261   :  { %v2025_v5 = vmul.f32 10.0, %v2005_v47 }
 0x262   :  { %2046 = vst [vmem:[#allocation3 + $0x98] sm:$0xff] %v2026_v35  ;;  %v2443_v37 = vpop.f32.mrb[64].mxu1 }
 0x263   :  { %2045 = vst [vmem:[#allocation3 + $0x90] sm:$0xff] %v2025_v5  ;;  %2048 = vst [vmem:[#allocation3 + $0xa8] sm:$0xff] %v2443_v37  ;;  %v1678_v20 = vpop.f32.mrb[65].mxu1 }
 0x264   :  { %2047 = vst [vmem:[#allocation3 + $0xa0] sm:$0xff] %v1678_v20 }
 0x26c   :  { %v2446_v19 = vpop.f32.mrb[66].mxu1 }
 0x26d   :  { %2050 = vst [vmem:[#allocation3 + $0xb8] sm:$0xff] %v2446_v19  ;;  %v1688_v59 = vpop.f32.mrb[67].mxu1 }
 0x26e   :  { %2049 = vst [vmem:[#allocation3 + $0xb0] sm:$0xff] %v1688_v59 }
 0x272   :  { %v2449_v33 = vpop.f32.mrb[68].mxu1 }
 0x273   :  { %2052 = vst [vmem:[#allocation3 + $0xc8] sm:$0xff] %v2449_v33  ;;  %v1698_v31 = vpop.f32.mrb[69].mxu1 }
 0x274   :  { %2051 = vst [vmem:[#allocation3 + $0xc0] sm:$0xff] %v1698_v31 }
 0x276   :  { %v2452_v15 = vpop.f32.mrb[70].mxu1 }
 0x277   :  { %2054 = vst [vmem:[#allocation3 + $0xd8] sm:$0xff] %v2452_v15  ;;  %v1708_v44 = vpop.f32.mrb[71].mxu1 }
 0x278   :  { %2053 = vst [vmem:[#allocation3 + $0xd0] sm:$0xff] %v1708_v44 }
 0x27a   :  { %v2455_v32 = vpop.f32.mrb[72].mxu1 }
 0x27b   :  { %2056 = vst [vmem:[#allocation3 + $0xe8] sm:$0xff] %v2455_v32  ;;  %v1718_v3 = vpop.f32.mrb[73].mxu1 }
 0x27c   :  { %2055 = vst [vmem:[#allocation3 + $0xe0] sm:$0xff] %v1718_v3 }
 0x27e   :  { %v2458_v14 = vpop.f32.mrb[74].mxu1 }
 0x27f   :  { %2058 = vst [vmem:[#allocation3 + $0xf8] sm:$0xff] %v2458_v14  ;;  %v1728_v45 = vpop.f32.mrb[75].mxu1 }
 0x280   :  { %2057 = vst [vmem:[#allocation3 + $0xf0] sm:$0xff] %v1728_v45 }
 0x282   :  { %v2461_v48 = vpop.f32.mrb[76].mxu1 }
 0x283   :  { %2060 = vst [vmem:[#allocation3 + $0x108] sm:$0xff] %v2461_v48  ;;  %v1738_v8 = vpop.f32.mrb[77].mxu1 }
 0x284   :  { %2059 = vst [vmem:[#allocation3 + $0x100] sm:$0xff] %v1738_v8 }
 0x286   :  { %v2464_v23 = vpop.f32.mrb[78].mxu1 }
 0x287   :  { %v2062_v4 = vmax.f32 %v2464_v23, 1e-10  ;;  %v1748_v28 = vpop.f32.mrb[79].mxu1 }
 0x288   :  { %2061 = vst [vmem:[#allocation3 + $0x110] sm:$0xff] %v1748_v28 }
 0x289   :  { %2732 = vlog2.f32 %v2062_v4 }
 0x28a   :  { %v2467_v24 = vpop.f32.mrb[80].mxu1 }
 0x28b   :  { %v2064_v16 = vmax.f32 %v2467_v24, 1e-10  ;;  %v1758_v12 = vpop.f32.mrb[81].mxu1 }
 0x28c   :  { %v2063_v55 = vmax.f32 %v1758_v12, 1e-10 }
 0x28d   :  { %2734 = vlog2.f32 %v2064_v16 }
 0x28e   :  { %2736 = vlog2.f32 %v2063_v55  ;;  %v2470_v6 = vpop.f32.mrb[82].mxu1 }
 0x28f   :  { %v2066_v53 = vmax.f32 %v2470_v6, 1e-10  ;;  %v1768_v50 = vpop.f32.mrb[83].mxu1 }
 0x290   :  { %v2065_v60 = vmax.f32 %v1768_v50, 1e-10 }
 0x291   :  { %2738 = vlog2.f32 %v2066_v53 }
 0x292   :  { %2740 = vlog2.f32 %v2065_v60  ;;  %v2473_v52 = vpop.f32.mrb[84].mxu1 }
 0x293   :  { %v2733_v56 = vpop.eup %2732  ;;  %v2068_v30 = vmax.f32 %v2473_v52, 1e-10  ;;  %v1778_v7 = vpop.f32.mrb[85].mxu1 }
 0x294   :  { %v2083_v41 = vmul.f32 0.6931472, %v2733_v56  ;;  %v2067_v17 = vmax.f32 %v1778_v7, 1e-10 }
 0x295   :  { %2742 = vlog2.f32 %v2068_v30 }
 0x296   :  { %v2122_v54 = vmul.f32 0.4342945, %v2083_v41  ;;  %2744 = vlog2.f32 %v2067_v17  ;;  %v2476_v13 = vpop.f32.mrb[86].mxu1 }
 0x297   :  { %v2735_v43 = vpop.eup %2734  ;;  %v2070_v58 = vmax.f32 %v2476_v13, 1e-10  ;;  %v1788_v25 = vpop.f32.mrb[87].mxu1 }
 0x298   :  { %v2737_v29 = vpop.eup %2736  ;;  %v2142_v21 = vmul.f32 10.0, %v2122_v54  ;;  %v2087_v46 = vmul.f32 0.6931472, %v2735_v43  ;;  %v2069_v39 = vmax.f32 %v1788_v25, 1e-10 }
 0x299   :  { %v2085_v62 = vmul.f32 0.6931472, %v2737_v29  ;;  %2746 = vlog2.f32 %v2070_v58 }
 0x29a   :  { %2162 = vst [vmem:[#allocation3 + $0x118] sm:$0xff] %v2142_v21  ;;  %v2124_v9 = vmul.f32 0.4342945, %v2087_v46  ;;  %2748 = vlog2.f32 %v2069_v39  ;;  %v2479_v22 = vpop.f32.mrb[88].mxu1 }
 0x29b   :  { %v2739_v42 = vpop.eup %2738  ;;  %v2123_v63 = vmul.f32 0.4342945, %v2085_v62  ;;  %v2072_v40 = vmax.f32 %v2479_v22, 1e-10  ;;  %v1798_v10 = vpop.f32.mrb[89].mxu1 }
 0x29c   :  { %v2741_v49 = vpop.eup %2740  ;;  %v2144_v34 = vmul.f32 10.0, %v2124_v9  ;;  %v2091_v27 = vmul.f32 0.6931472, %v2739_v42  ;;  %v2071_v38 = vmax.f32 %v1798_v10, 1e-10 }
 0x29d   :  { %v2143_v26 = vmul.f32 10.0, %v2123_v63  ;;  %v2089_v57 = vmul.f32 0.6931472, %v2741_v49  ;;  %2750 = vlog2.f32 %v2072_v40 }
 0x29e   :  { %2164 = vst [vmem:[#allocation3 + $0x128] sm:$0xff] %v2144_v34  ;;  %v2126_v18 = vmul.f32 0.4342945, %v2091_v27  ;;  %2752 = vlog2.f32 %v2071_v38  ;;  %v2482_v0 = vpop.f32.mrb[90].mxu1 }
 0x29f   :  { %v2743_v1 = vpop.eup %2742  ;;  %2163 = vst [vmem:[#allocation3 + $0x120] sm:$0xff] %v2143_v26  ;;  %v2125_v11 = vmul.f32 0.4342945, %v2089_v57  ;;  %v2074_v36 = vmax.f32 %v2482_v0, 1e-10  ;;  %v1808_v61 = vpop.f32.mrb[91].mxu1 }
 0x2a0   :  { %v2745_v51 = vpop.eup %2744  ;;  %v2146_v2 = vmul.f32 10.0, %v2126_v18  ;;  %v2095_v47 = vmul.f32 0.6931472, %v2743_v1  ;;  %v2073_v35 = vmax.f32 %v1808_v61, 1e-10 }
 0x2a1   :  { %v2145_v5 = vmul.f32 10.0, %v2125_v11  ;;  %v2093_v37 = vmul.f32 0.6931472, %v2745_v51  ;;  %2754 = vlog2.f32 %v2074_v36 }
 0x2a2   :  { %2166 = vst [vmem:[#allocation3 + $0x138] sm:$0xff] %v2146_v2  ;;  %v2128_v20 = vmul.f32 0.4342945, %v2095_v47  ;;  %2756 = vlog2.f32 %v2073_v35  ;;  %v2485_v19 = vpop.f32.mrb[92].mxu1 }
 0x2a3   :  { %v2747_v59 = vpop.eup %2746  ;;  %2165 = vst [vmem:[#allocation3 + $0x130] sm:$0xff] %v2145_v5  ;;  %v2127_v33 = vmul.f32 0.4342945, %v2093_v37  ;;  %v2076_v31 = vmax.f32 %v2485_v19, 1e-10  ;;  %v1818_v15 = vpop.f32.mrb[93].mxu1 }
 0x2a4   :  { %v2749_v44 = vpop.eup %2748  ;;  %v2148_v32 = vmul.f32 10.0, %v2128_v20  ;;  %v2099_v3 = vmul.f32 0.6931472, %v2747_v59  ;;  %v2075_v14 = vmax.f32 %v1818_v15, 1e-10 }
 0x2a5   :  { %v2147_v45 = vmul.f32 10.0, %v2127_v33  ;;  %v2097_v48 = vmul.f32 0.6931472, %v2749_v44  ;;  %2758 = vlog2.f32 %v2076_v31 }
 0x2a6   :  { %2168 = vst [vmem:[#allocation3 + $0x148] sm:$0xff] %v2148_v32  ;;  %v2130_v8 = vmul.f32 0.4342945, %v2099_v3  ;;  %2760 = vlog2.f32 %v2075_v14  ;;  %v2488_v23 = vpop.f32.mrb[94].mxu1 }
 0x2a7   :  { %v2751_v4 = vpop.eup %2750  ;;  %2167 = vst [vmem:[#allocation3 + $0x140] sm:$0xff] %v2147_v45  ;;  %v2129_v28 = vmul.f32 0.4342945, %v2097_v48  ;;  %v2078_v24 = vmax.f32 %v2488_v23, 1e-10  ;;  %v1828_v16 = vpop.f32.mrb[95].mxu1 }
 0x2a8   :  { %v2753_v12 = vpop.eup %2752  ;;  %v2150_v55 = vmul.f32 10.0, %v2130_v8  ;;  %v2103_v6 = vmul.f32 0.6931472, %v2751_v4  ;;  %v2077_v53 = vmax.f32 %v1828_v16, 1e-10 }
 0x2a9   :  { %v2149_v50 = vmul.f32 10.0, %v2129_v28  ;;  %v2101_v60 = vmul.f32 0.6931472, %v2753_v12  ;;  %2762 = vlog2.f32 %v2078_v24 }
 0x2aa   :  { %2170 = vst [vmem:[#allocation3 + $0x158] sm:$0xff] %v2150_v55  ;;  %v2132_v52 = vmul.f32 0.4342945, %v2103_v6  ;;  %2764 = vlog2.f32 %v2077_v53  ;;  %v2491_v56 = vpop.f32.mrb[96].mxu1 }
 0x2ab   :  { %v2755_v30 = vpop.eup %2754  ;;  %2169 = vst [vmem:[#allocation3 + $0x150] sm:$0xff] %v2149_v50  ;;  %v2131_v7 = vmul.f32 0.4342945, %v2101_v60  ;;  %v2080_v41 = vmax.f32 %v2491_v56, 1e-10  ;;  %v1838_v17 = vpop.f32.mrb[97].mxu1 }
 0x2ac   :  { %v2757_v54 = vpop.eup %2756  ;;  %v2152_v13 = vmul.f32 10.0, %v2132_v52  ;;  %v2107_v43 = vmul.f32 0.6931472, %v2755_v30  ;;  %v2079_v58 = vmax.f32 %v1838_v17, 1e-10 }
 0x2ad   :  { %v2151_v25 = vmul.f32 10.0, %v2131_v7  ;;  %v2105_v29 = vmul.f32 0.6931472, %v2757_v54  ;;  %2766 = vlog2.f32 %v2080_v41 }
 0x2ae   :  { %2172 = vst [vmem:[#allocation3 + $0x168] sm:$0xff] %v2152_v13  ;;  %v2134_v21 = vmul.f32 0.4342945, %v2107_v43  ;;  %2768 = vlog2.f32 %v2079_v58 }
 0x2af   :  { %v2759_v46 = vpop.eup %2758  ;;  %2171 = vst [vmem:[#allocation3 + $0x160] sm:$0xff] %v2151_v25  ;;  %v2133_v39 = vmul.f32 0.4342945, %v2105_v29 }
 0x2b0   :  { %v2494_v62 = vpop.f32.mrb[98].mxu1  ;;  %v2761_v9 = vpop.eup %2760  ;;  %v2154_v22 = vmul.f32 10.0, %v2134_v21  ;;  %v2111_v42 = vmul.f32 0.6931472, %v2759_v46 }
 0x2b1   :  { %2182 = vst [vmem:[#allocation3 + $0x1b8] sm:$0xff] %v2494_v62  ;;  %v1848_v63 = vpop.f32.mrb[99].mxu1  ;;  %v2153_v40 = vmul.f32 10.0, %v2133_v39  ;;  %v2109_v10 = vmul.f32 0.6931472, %v2761_v9 }
 0x2b2   :  { %v2081_v49 = vmax.f32 %v1848_v63, 1e-10  ;;  %2174 = vst [vmem:[#allocation3 + $0x178] sm:$0xff] %v2154_v22  ;;  %v2136_v34 = vmul.f32 0.4342945, %v2111_v42 }
 0x2b3   :  { %v2763_v27 = vpop.eup %2762  ;;  %2173 = vst [vmem:[#allocation3 + $0x170] sm:$0xff] %v2153_v40  ;;  %v2135_v38 = vmul.f32 0.4342945, %v2109_v10 }
 0x2b4   :  { %2770 = vlog2.f32 %v2081_v49  ;;  %v2765_v26 = vpop.eup %2764  ;;  %v2156_v57 = vmul.f32 10.0, %v2136_v34  ;;  %v2115_v18 = vmul.f32 0.6931472, %v2763_v27 }
 0x2b5   :  { %v2155_v0 = vmul.f32 10.0, %v2135_v38  ;;  %v2113_v1 = vmul.f32 0.6931472, %v2765_v26 }
 0x2b6   :  { %2176 = vst [vmem:[#allocation3 + $0x188] sm:$0xff] %v2156_v57  ;;  %v2138_v11 = vmul.f32 0.4342945, %v2115_v18 }
 0x2b7   :  { %v2767_v36 = vpop.eup %2766  ;;  %2175 = vst [vmem:[#allocation3 + $0x180] sm:$0xff] %v2155_v0  ;;  %v2137_v61 = vmul.f32 0.4342945, %v2113_v1 }
 0x2b8   :  { %v2769_v51 = vpop.eup %2768  ;;  %v2158_v2 = vmul.f32 10.0, %v2138_v11  ;;  %v2119_v47 = vmul.f32 0.6931472, %v2767_v36  ;;  %v2497_v37 = vpop.f32.mrb[100].mxu1 }
 0x2b9   :  { %v2157_v35 = vmul.f32 10.0, %v2137_v61  ;;  %v2117_v5 = vmul.f32 0.6931472, %v2769_v51  ;;  %2184 = vst [vmem:[#allocation3 + $0x1c8] sm:$0xff] %v2497_v37  ;;  %v1858_v19 = vpop.f32.mrb[101].mxu1 }
 0x2ba   :  { %2178 = vst [vmem:[#allocation3 + $0x198] sm:$0xff] %v2158_v2  ;;  %v2140_v20 = vmul.f32 0.4342945, %v2119_v47  ;;  %2183 = vst [vmem:[#allocation3 + $0x1c0] sm:$0xff] %v1858_v19 }
 0x2bb   :  { %2177 = vst [vmem:[#allocation3 + $0x190] sm:$0xff] %v2157_v35  ;;  %v2139_v59 = vmul.f32 0.4342945, %v2117_v5 }
 0x2bc   :  { %v2160_v33 = vmul.f32 10.0, %v2140_v20 }
 0x2bd   :  { %v2159_v15 = vmul.f32 10.0, %v2139_v59 }
 0x2be   :  { %v2771_v31 = vpop.eup %2770  ;;  %2180 = vst [vmem:[#allocation3 + $0x1a8] sm:$0xff] %v2160_v33 }
 0x2bf   :  { %v2121_v44 = vmul.f32 0.6931472, %v2771_v31  ;;  %2179 = vst [vmem:[#allocation3 + $0x1a0] sm:$0xff] %v2159_v15 }
 0x2c1   :  { %v2141_v32 = vmul.f32 0.4342945, %v2121_v44 }
 0x2c2   :  { %v2500_v3 = vpop.f32.mrb[102].mxu1 }
 0x2c3   :  { %v2161_v14 = vmul.f32 10.0, %v2141_v32  ;;  %2186 = vst [vmem:[#allocation3 + $0x1d8] sm:$0xff] %v2500_v3  ;;  %v1868_v45 = vpop.f32.mrb[103].mxu1 }
 0x2c4   :  { %2185 = vst [vmem:[#allocation3 + $0x1d0] sm:$0xff] %v1868_v45 }
 0x2c5   :  { %2181 = vst [vmem:[#allocation3 + $0x1b0] sm:$0xff] %v2161_v14 }
 0x2c6   :  { %v2503_v48 = vpop.f32.mrb[104].mxu1 }
 0x2c7   :  { %2188 = vst [vmem:[#allocation3 + $0x1e8] sm:$0xff] %v2503_v48  ;;  %v1878_v8 = vpop.f32.mrb[105].mxu1 }
 0x2c8   :  { %2187 = vst [vmem:[#allocation3 + $0x1e0] sm:$0xff] %v1878_v8 }
 0x2ca   :  { %v2506_v23 = vpop.f32.mrb[106].mxu1 }
 0x2cb   :  { %2190 = vst [vmem:[#allocation3 + $0x1f8] sm:$0xff] %v2506_v23  ;;  %v1888_v4 = vpop.f32.mrb[107].mxu1 }
 0x2cc   :  { %2189 = vst [vmem:[#allocation3 + $0x1f0] sm:$0xff] %v1888_v4 }
 0x2ce   :  { %v2509_v28 = vpop.f32.mrb[108].mxu1 }
 0x2cf   :  { %2192 = vst [vmem:[#allocation3 + $0x208] sm:$0xff] %v2509_v28  ;;  %v1898_v24 = vpop.f32.mrb[109].mxu1 }
 0x2d0   :  { %2191 = vst [vmem:[#allocation3 + $0x200] sm:$0xff] %v1898_v24 }
 0x2d2   :  { %v2512_v16 = vpop.f32.mrb[110].mxu1 }
 0x2d3   :  { %2194 = vst [vmem:[#allocation3 + $0x218] sm:$0xff] %v2512_v16  ;;  %v1908_v12 = vpop.f32.mrb[111].mxu1 }
 0x2d4   :  { %2193 = vst [vmem:[#allocation3 + $0x210] sm:$0xff] %v1908_v12 }
 0x2d6   :  { %v2515_v55 = vpop.f32.mrb[112].mxu1 }
 0x2d7   :  { %2196 = vst [vmem:[#allocation3 + $0x228] sm:$0xff] %v2515_v55  ;;  %v1918_v6 = vpop.f32.mrb[113].mxu1 }
 0x2d8   :  { %2195 = vst [vmem:[#allocation3 + $0x220] sm:$0xff] %v1918_v6 }
 0x2d9   :  { %2783 = shalt.err (!%p2780_p4)
}
 0x2da   :  { %s2784_s21 = scalar_lea.hbm %s3968_s3, 8960 }
 0x2db   :  { %p2785_p5 = scmp.ne.s32.totalorder %s3968_s3, %s2784_s21  ;;  %p2788_p6 = scmp.lt.u32.totalorder %s2784_s21, %s3968_s3 }
 0x2dd   :  { %p2790_p7 = pnand %p2788_p6, %p2785_p5 }
 0x2df   :  { %2793 = shalt.err (!%p2790_p7)
}
 0x2e0   :  { %s2798_s26 = smov 128   ;;  %s2799_s1 = smov 8  }
 0x2e1   :  { %2208 = dma.vmem_to_hbm [thread:$0]  %s2203_s17, 8960, %s3968_s3, [#allocation4], %s2798_s26, %s2798_s26, %s2799_s1  }
 0x2e2   :  { %2794 = dma.done.wait [#allocation4], 8960  }
 0x2e3   :  { %2795 = vsyncadd [#allocation4], 4294958336 }
 0x2e4   :  { %2212 = vsyncpa [#allocation4], 1 }

</bundles_post_ra>
